<compile_context>
chip_gen: v7x
topology: tpu7x:2x2x1
jax: 0.10.0
libtpu: 0.0.40
codegen_flags: <defaults>
</compile_context>

<pallas_src>
import jax
import jax.numpy as jnp
import numpy as np
from jax.experimental import pallas as pl
from jax.experimental.pallas import tpu as pltpu


_VMEM = pl.BlockSpec(memory_space=pltpu.MemorySpace.VMEM)


# --------------------------------------------------------------------------
# Pallas kernels
# --------------------------------------------------------------------------
def _conv1_pool_relu_kernel(p_ref, w_ref, b_ref, o_ref):
    """Fused conv1 + bias + 2x2 max-pool + relu.

    p_ref: [4, 25, B*144]  im2col patches, one slab per 2x2 pool offset.
    w_ref: [10, 25]        conv1 weight (rows = output channels).
    b_ref: [10, 1]         conv1 bias.
    o_ref: [10, B*144]     pooled+relu'd conv1 activation, cols = (b, y, x).
    """
    w = w_ref[...]
    m = jnp.dot(w, p_ref[0], preferred_element_type=jnp.float32)
    for q in range(1, p_ref.shape[0]):
        m = jnp.maximum(m, jnp.dot(w, p_ref[q], preferred_element_type=jnp.float32))
    # max(conv) + bias == max(conv + bias) since bias is constant per channel.
    o_ref[...] = jnp.maximum(m + b_ref[...], 0.0).astype(o_ref.dtype)


def _conv2_pool_fc_kernel(p_ref, w2_ref, b2_ref, wf1_ref, bf1_ref,
                          wf2_ref, bf2_ref, o_ref):
    """Fused conv2 + bias + 2x2 max-pool + relu + fc1 + relu + fc2.

    p_ref:  [4, B*16, 250] im2col patches of the conv1 activation, one slab per
                           2x2 pool offset; rows ordered (y, x, b), b fastest.
    w2_ref: [250, 20]      conv2 weight, K-major.
    b2_ref: [1, 20]
    wf1_ref:[16, 20, 50]   fc1 weight regrouped per pooled spatial position s:
                           wf1_ref[s, c, n] = Wf1[n, c*16 + s].
    bf1_ref:[1, 50]
    wf2_ref:[50, 10]       fc2 weight, K-major.
    bf2_ref:[1, 10]
    o_ref:  [B, 10]        logits.
    """
    nb = o_ref.shape[0]

    # conv2 GEMM + max over the 4 pool offsets + bias + relu  -> [B*16, 20]
    w2 = w2_ref[...]
    h = jnp.dot(p_ref[0], w2, preferred_element_type=jnp.float32)
    for q in range(1, p_ref.shape[0]):
        h = jnp.maximum(h, jnp.dot(p_ref[q], w2, preferred_element_type=jnp.float32))
    a2 = jnp.maximum(h + b2_ref[...], 0.0)
    # TODO(synk): Dropout2d is identity here (inference mode); training-mode
    #             RNG channel masks are not implemented.

    # fc1: torch's .view(-1, 320) flattens over (channel, y, x).  Channels live
    # on lanes and (y, x, b) on sublanes, so accumulate one [B,20]@[20,50] GEMM
    # per pooled spatial position s (everything stays in registers/VMEM).
    z = jnp.zeros((nb, wf1_ref.shape[2]), jnp.float32)
    for s in range(wf1_ref.shape[0]):
        z = z + jnp.dot(a2[s * nb:(s + 1) * nb, :], wf1_ref[s],
                        preferred_element_type=jnp.float32)
    z = jnp.maximum(z + bf1_ref[...], 0.0)                       # [B, 50]
    # TODO(synk): F.dropout is identity here (inference mode).

    o_ref[...] = (jnp.dot(z, wf2_ref[...], preferred_element_type=jnp.float32)
                  + bf2_ref[...]).astype(o_ref.dtype)


# --------------------------------------------------------------------------
# XLA-side glue: im2col patches pre-split by 2x2 max-pool offset
# --------------------------------------------------------------------------
def _pool_offset_patches(a, k, out_hw):
    """im2col patches of NCHW `a`, pre-split by 2x2 max-pool offset.

    Returns [4, B, C*k*k, out_hw, out_hw] where
      out[dy*2+dx, b, c*k*k + ki*k + kj, y, x] = a[b, c, 2*y+dy+ki, 2*x+dx+kj]
    (stride-2 VALID patches; channel-major features == PyTorch weight flatten).
    """
    B, C, _, _ = a.shape
    qs = []
    for dy in range(2):
        for dx in range(2):
            feats = []
            for ki in range(k):
                for kj in range(k):
                    y0, x0 = dy + ki, dx + kj
                    feats.append(a[:, :, y0:y0 + 2 * out_hw - 1:2,
                                   x0:x0 + 2 * out_hw - 1:2])
            p = jnp.stack(feats, axis=2).reshape(B, C * k * k, out_hw, out_hw)
            qs.append(p)
    return jnp.stack(qs, axis=0)


# --------------------------------------------------------------------------
# LeNet forward
# --------------------------------------------------------------------------
def lenet_forward(params, x):
    B, _, H, _ = x.shape                     # 1x28x28 inputs (fc1 expects 320)
    hp1 = (H - 5 + 1) // 2                   # 12
    hp2 = (hp1 - 5 + 1) // 2                 # 4
    npos = hp2 * hp2                         # 16

    # One-time weight re-layouts (tiny; kept in f32 for exact parity with the
    # f32 reference.  bf16 MXU operands would be a drop-in for larger batches).
    w1m = params["w1"].reshape(10, 25)                         # [Cout1, 25]
    b1c = params["b1"].reshape(10, 1)
    w2t = params["w2"].reshape(20, 250).T                      # [250, Cout2]
    b2r = params["b2"].reshape(1, 20)
    wf1r = params["wf1"].reshape(50, 20, npos).transpose(2, 1, 0)  # [16, 20, 50]
    bf1r = params["bf1"].reshape(1, 50)
    wf2t = params["wf2"].T                                     # [50, 10]
    bf2r = params["bf2"].reshape(1, 10)

    # ---- stage 1: conv1 + bias + max-pool(2) + relu --------------------------
    p1 = _pool_offset_patches(x, 5, hp1)                       # [4, B, 25, 12, 12]
    p1 = p1.transpose(0, 2, 1, 3, 4).reshape(4, 25, B * hp1 * hp1)
    pooled1 = pl.pallas_call(
        _conv1_pool_relu_kernel,
        out_shape=jax.ShapeDtypeStruct((10, B * hp1 * hp1), jnp.float32),
        in_specs=[_VMEM, _VMEM, _VMEM],
        out_specs=_VMEM,
    )(p1, w1m, b1c)                                            # [10, B*144]

    # ---- stage 2: conv2 + bias + max-pool(2) + relu + fc1 + relu + fc2 -------
    a1 = pooled1.reshape(10, B, hp1, hp1).transpose(1, 0, 2, 3)   # [B,10,12,12]
    p2 = _pool_offset_patches(a1, 5, hp2)                      # [4, B, 250, 4, 4]
    p2 = p2.transpose(0, 3, 4, 1, 2).reshape(4, npos * B, 250)  # rows = (y, x, b)
    logits = pl.pallas_call(
        _conv2_pool_fc_kernel,
        out_shape=jax.ShapeDtypeStruct((B, 10), jnp.float32),
        in_specs=[_VMEM] * 7,
        out_specs=_VMEM,
    )(p2, w2t, b2r, wf1r, bf1r, wf2t, bf2r)
    return logits


# --------------------------------------------------------------------------
# Pure-JAX reference (for correctness check only)
# --------------------------------------------------------------------------
def lenet_reference(params, x):
    dn = ("NCHW", "OIHW", "NCHW")
    y = jax.lax.conv_general_dilated(x, params["w1"], (1, 1), "VALID",
                                     dimension_numbers=dn)
    y = y + params["b1"][None, :, None, None]
    y = jax.nn.relu(jax.lax.reduce_window(y, -jnp.inf, jax.lax.max,
                                          (1, 1, 2, 2), (1, 1, 2, 2), "VALID"))
    y = jax.lax.conv_general_dilated(y, params["w2"], (1, 1), "VALID",
                                     dimension_numbers=dn)
    y = y + params["b2"][None, :, None, None]
    y = jax.nn.relu(jax.lax.reduce_window(y, -jnp.inf, jax.lax.max,
                                          (1, 1, 2, 2), (1, 1, 2, 2), "VALID"))
    y = y.reshape(y.shape[0], -1)
    y = jax.nn.relu(y @ params["wf1"].T + params["bf1"])
    y = y @ params["wf2"].T + params["bf2"]
    return y


def init_params(key):
    ks = jax.random.split(key, 8)

    def u(k, shape, fan_in):
        lim = 1.0 / float(np.sqrt(fan_in))
        return jax.random.uniform(k, shape, jnp.float32, -lim, lim)

    return {
        "w1": u(ks[0], (10, 1, 5, 5), 1 * 25),
        "b1": u(ks[1], (10,), 1 * 25),
        "w2": u(ks[2], (20, 10, 5, 5), 10 * 25),
        "b2": u(ks[3], (20,), 10 * 25),
        "wf1": u(ks[4], (50, 320), 320),
        "bf1": u(ks[5], (50,), 320),
        "wf2": u(ks[6], (10, 50), 50),
        "bf2": u(ks[7], (10,), 50),
    }


if __name__ == "__main__":
    key = jax.random.PRNGKey(0)
    pkey, xkey = jax.random.split(key)
    params = init_params(pkey)

    # LeNet's fc1 (in_features=320 = 20*4*4) implies 1x28x28 inputs.
    x = jax.random.normal(xkey, (2, 1, 28, 28), dtype=jnp.float32)

    out = jax.block_until_ready(jax.jit(lenet_forward)(params, x))
    ref = jax.block_until_ready(jax.jit(lenet_reference)(params, x))

    assert out.shape == (2, 10), out.shape
    np.testing.assert_allclose(np.asarray(out), np.asarray(ref),
                               rtol=5e-3, atol=5e-3)
    print("KERNEL_OK")
</pallas_src>

<mosaic_0001>
module attributes {stable_mosaic.version = 11 : i64} {
  func.func @_conv1_pool_relu_kernel(%arg0: memref<4x25x288xf32, #tpu.memory_space<vmem>>, %arg1: memref<10x25xf32, #tpu.memory_space<vmem>>, %arg2: memref<10x1xf32, #tpu.memory_space<vmem>>, %arg3: memref<10x288xf32, #tpu.memory_space<vmem>>) attributes {dimension_semantics = [], scalar_prefetch = 0 : i64, scratch_operands = 0 : i64, tpu.core_type = #tpu.core_type<tc>} {
    %c0 = arith.constant 0 : index
    %c0_0 = arith.constant 0 : index
    %0 = vector.load %arg1[%c0, %c0_0] : memref<10x25xf32, #tpu.memory_space<vmem>>, vector<10x25xf32>
    %c0_1 = arith.constant 0 : index
    %c0_2 = arith.constant 0 : index
    %c0_3 = arith.constant 0 : index
    %1 = vector.load %arg0[%c0_1, %c0_2, %c0_3] : memref<4x25x288xf32, #tpu.memory_space<vmem>>, vector<1x25x288xf32>
    %2 = vector.shape_cast %1 : vector<1x25x288xf32> to vector<25x288xf32>
    %cst = arith.constant dense<0.000000e+00> : vector<10x288xf32>
    %3 = tpu.matmul %0, %2, %cst {dimension_numbers = #tpu.dot_dimension_numbers<[1], [0], [0], [1], [0, 0, 1, 1], [], []>} : vector<10x25xf32>, vector<25x288xf32>, vector<10x288xf32> -> vector<10x288xf32>
    %c1 = arith.constant 1 : index
    %c0_4 = arith.constant 0 : index
    %c0_5 = arith.constant 0 : index
    %4 = vector.load %arg0[%c1, %c0_4, %c0_5] : memref<4x25x288xf32, #tpu.memory_space<vmem>>, vector<1x25x288xf32>
    %5 = vector.shape_cast %4 : vector<1x25x288xf32> to vector<25x288xf32>
    %cst_6 = arith.constant dense<0.000000e+00> : vector<10x288xf32>
    %6 = tpu.matmul %0, %5, %cst_6 {dimension_numbers = #tpu.dot_dimension_numbers<[1], [0], [0], [1], [0, 0, 1, 1], [], []>} : vector<10x25xf32>, vector<25x288xf32>, vector<10x288xf32> -> vector<10x288xf32>
    %7 = arith.maximumf %3, %6 : vector<10x288xf32>
    %c2 = arith.constant 2 : index
    %c0_7 = arith.constant 0 : index
    %c0_8 = arith.constant 0 : index
    %8 = vector.load %arg0[%c2, %c0_7, %c0_8] : memref<4x25x288xf32, #tpu.memory_space<vmem>>, vector<1x25x288xf32>
    %9 = vector.shape_cast %8 : vector<1x25x288xf32> to vector<25x288xf32>
    %cst_9 = arith.constant dense<0.000000e+00> : vector<10x288xf32>
    %10 = tpu.matmul %0, %9, %cst_9 {dimension_numbers = #tpu.dot_dimension_numbers<[1], [0], [0], [1], [0, 0, 1, 1], [], []>} : vector<10x25xf32>, vector<25x288xf32>, vector<10x288xf32> -> vector<10x288xf32>
    %11 = arith.maximumf %7, %10 : vector<10x288xf32>
    %c3 = arith.constant 3 : index
    %c0_10 = arith.constant 0 : index
    %c0_11 = arith.constant 0 : index
    %12 = vector.load %arg0[%c3, %c0_10, %c0_11] : memref<4x25x288xf32, #tpu.memory_space<vmem>>, vector<1x25x288xf32>
    %13 = vector.shape_cast %12 : vector<1x25x288xf32> to vector<25x288xf32>
    %cst_12 = arith.constant dense<0.000000e+00> : vector<10x288xf32>
    %14 = tpu.matmul %0, %13, %cst_12 {dimension_numbers = #tpu.dot_dimension_numbers<[1], [0], [0], [1], [0, 0, 1, 1], [], []>} : vector<10x25xf32>, vector<25x288xf32>, vector<10x288xf32> -> vector<10x288xf32>
    %15 = arith.maximumf %11, %14 : vector<10x288xf32>
    %c0_13 = arith.constant 0 : index
    %c0_14 = arith.constant 0 : index
    %16 = vector.load %arg2[%c0_13, %c0_14] : memref<10x1xf32, #tpu.memory_space<vmem>>, vector<10x1xf32>
    %17 = vector.broadcast %16 : vector<10x1xf32> to vector<10x288xf32>
    %18 = arith.addf %15, %17 : vector<10x288xf32>
    %cst_15 = arith.constant 0.000000e+00 : f32
    %19 = vector.broadcast %cst_15 : f32 to vector<10x288xf32>
    %20 = arith.maximumf %18, %19 : vector<10x288xf32>
    %c0_16 = arith.constant 0 : index
    %c0_17 = arith.constant 0 : index
    %21 = vector.load %arg3[%c0_16, %c0_17] : memref<10x288xf32, #tpu.memory_space<vmem>>, vector<10x288xf32>
    tpu.vector_store %arg3[%c0_16, %c0_17], %20 {strides = array<i32>} : memref<10x288xf32, #tpu.memory_space<vmem>>, vector<10x288xf32>,
    return
  }
}

module attributes {stable_mosaic.version = 11 : i64} {
  func.func @_conv2_pool_fc_kernel(%arg0: memref<4x32x250xf32, #tpu.memory_space<vmem>>, %arg1: memref<250x20xf32, #tpu.memory_space<vmem>>, %arg2: memref<1x20xf32, #tpu.memory_space<vmem>>, %arg3: memref<16x20x50xf32, #tpu.memory_space<vmem>>, %arg4: memref<1x50xf32, #tpu.memory_space<vmem>>, %arg5: memref<50x10xf32, #tpu.memory_space<vmem>>, %arg6: memref<1x10xf32, #tpu.memory_space<vmem>>, %arg7: memref<2x10xf32, #tpu.memory_space<vmem>>) attributes {dimension_semantics = [], scalar_prefetch = 0 : i64, scratch_operands = 0 : i64, tpu.core_type = #tpu.core_type<tc>} {
    %c0 = arith.constant 0 : index
    %c0_0 = arith.constant 0 : index
    %0 = vector.load %arg1[%c0, %c0_0] : memref<250x20xf32, #tpu.memory_space<vmem>>, vector<250x20xf32>
    %c0_1 = arith.constant 0 : index
    %c0_2 = arith.constant 0 : index
    %c0_3 = arith.constant 0 : index
    %1 = vector.load %arg0[%c0_1, %c0_2, %c0_3] : memref<4x32x250xf32, #tpu.memory_space<vmem>>, vector<1x32x250xf32>
    %2 = vector.shape_cast %1 : vector<1x32x250xf32> to vector<32x250xf32>
    %cst = arith.constant dense<0.000000e+00> : vector<32x20xf32>
    %3 = tpu.matmul %2, %0, %cst {dimension_numbers = #tpu.dot_dimension_numbers<[1], [0], [0], [1], [0, 0, 1, 1], [], []>} : vector<32x250xf32>, vector<250x20xf32>, vector<32x20xf32> -> vector<32x20xf32>
    %c1 = arith.constant 1 : index
    %c0_4 = arith.constant 0 : index
    %c0_5 = arith.constant 0 : index
    %4 = vector.load %arg0[%c1, %c0_4, %c0_5] : memref<4x32x250xf32, #tpu.memory_space<vmem>>, vector<1x32x250xf32>
    %5 = vector.shape_cast %4 : vector<1x32x250xf32> to vector<32x250xf32>
    %cst_6 = arith.constant dense<0.000000e+00> : vector<32x20xf32>
    %6 = tpu.matmul %5, %0, %cst_6 {dimension_numbers = #tpu.dot_dimension_numbers<[1], [0], [0], [1], [0, 0, 1, 1], [], []>} : vector<32x250xf32>, vector<250x20xf32>, vector<32x20xf32> -> vector<32x20xf32>
    %7 = arith.maximumf %3, %6 : vector<32x20xf32>
    %c2 = arith.constant 2 : index
    %c0_7 = arith.constant 0 : index
    %c0_8 = arith.constant 0 : index
    %8 = vector.load %arg0[%c2, %c0_7, %c0_8] : memref<4x32x250xf32, #tpu.memory_space<vmem>>, vector<1x32x250xf32>
    %9 = vector.shape_cast %8 : vector<1x32x250xf32> to vector<32x250xf32>
    %cst_9 = arith.constant dense<0.000000e+00> : vector<32x20xf32>
    %10 = tpu.matmul %9, %0, %cst_9 {dimension_numbers = #tpu.dot_dimension_numbers<[1], [0], [0], [1], [0, 0, 1, 1], [], []>} : vector<32x250xf32>, vector<250x20xf32>, vector<32x20xf32> -> vector<32x20xf32>
    %11 = arith.maximumf %7, %10 : vector<32x20xf32>
    %c3 = arith.constant 3 : index
    %c0_10 = arith.constant 0 : index
    %c0_11 = arith.constant 0 : index
    %12 = vector.load %arg0[%c3, %c0_10, %c0_11] : memref<4x32x250xf32, #tpu.memory_space<vmem>>, vector<1x32x250xf32>
    %13 = vector.shape_cast %12 : vector<1x32x250xf32> to vector<32x250xf32>
    %cst_12 = arith.constant dense<0.000000e+00> : vector<32x20xf32>
    %14 = tpu.matmul %13, %0, %cst_12 {dimension_numbers = #tpu.dot_dimension_numbers<[1], [0], [0], [1], [0, 0, 1, 1], [], []>} : vector<32x250xf32>, vector<250x20xf32>, vector<32x20xf32> -> vector<32x20xf32>
    %15 = arith.maximumf %11, %14 : vector<32x20xf32>
    %c0_13 = arith.constant 0 : index
    %c0_14 = arith.constant 0 : index
    %16 = vector.load %arg2[%c0_13, %c0_14] : memref<1x20xf32, #tpu.memory_space<vmem>>, vector<1x20xf32>
    %17 = vector.broadcast %16 : vector<1x20xf32> to vector<32x20xf32>
    %18 = arith.addf %15, %17 : vector<32x20xf32>
    %cst_15 = arith.constant 0.000000e+00 : f32
    %19 = vector.broadcast %cst_15 : f32 to vector<32x20xf32>
    %20 = arith.maximumf %18, %19 : vector<32x20xf32>
    %cst_16 = arith.constant 0.000000e+00 : f32
    %21 = vector.broadcast %cst_16 : f32 to vector<2x50xf32>
    %22 = vector.extract_strided_slice %20 {offsets = [0, 0], sizes = [2, 20], strides = [1, 1]} : vector<32x20xf32> to vector<2x20xf32>
    %c0_17 = arith.constant 0 : index
    %c0_18 = arith.constant 0 : index
    %c0_19 = arith.constant 0 : index
    %23 = vector.load %arg3[%c0_17, %c0_18, %c0_19] : memref<16x20x50xf32, #tpu.memory_space<vmem>>, vector<1x20x50xf32>
    %24 = vector.shape_cast %23 : vector<1x20x50xf32> to vector<20x50xf32>
    %cst_20 = arith.constant dense<0.000000e+00> : vector<2x50xf32>
    %25 = tpu.matmul %22, %24, %cst_20 {dimension_numbers = #tpu.dot_dimension_numbers<[1], [0], [0], [1], [0, 0, 1, 1], [], []>} : vector<2x20xf32>, vector<20x50xf32>, vector<2x50xf32> -> vector<2x50xf32>
    %26 = arith.addf %21, %25 : vector<2x50xf32>
    %27 = vector.extract_strided_slice %20 {offsets = [2, 0], sizes = [2, 20], strides = [1, 1]} : vector<32x20xf32> to vector<2x20xf32>
    %c1_21 = arith.constant 1 : index
    %c0_22 = arith.constant 0 : index
    %c0_23 = arith.constant 0 : index
    %28 = vector.load %arg3[%c1_21, %c0_22, %c0_23] : memref<16x20x50xf32, #tpu.memory_space<vmem>>, vector<1x20x50xf32>
    %29 = vector.shape_cast %28 : vector<1x20x50xf32> to vector<20x50xf32>
    %cst_24 = arith.constant dense<0.000000e+00> : vector<2x50xf32>
    %30 = tpu.matmul %27, %29, %cst_24 {dimension_numbers = #tpu.dot_dimension_numbers<[1], [0], [0], [1], [0, 0, 1, 1], [], []>} : vector<2x20xf32>, vector<20x50xf32>, vector<2x50xf32> -> vector<2x50xf32>
    %31 = arith.addf %26, %30 : vector<2x50xf32>
    %32 = vector.extract_strided_slice %20 {offsets = [4, 0], sizes = [2, 20], strides = [1, 1]} : vector<32x20xf32> to vector<2x20xf32>
    %c2_25 = arith.constant 2 : index
    %c0_26 = arith.constant 0 : index
    %c0_27 = arith.constant 0 : index
    %33 = vector.load %arg3[%c2_25, %c0_26, %c0_27] : memref<16x20x50xf32, #tpu.memory_space<vmem>>, vector<1x20x50xf32>
    %34 = vector.shape_cast %33 : vector<1x20x50xf32> to vector<20x50xf32>
    %cst_28 = arith.constant dense<0.000000e+00> : vector<2x50xf32>
    %35 = tpu.matmul %32, %34, %cst_28 {dimension_numbers = #tpu.dot_dimension_numbers<[1], [0], [0], [1], [0, 0, 1, 1], [], []>} : vector<2x20xf32>, vector<20x50xf32>, vector<2x50xf32> -> vector<2x50xf32>
    %36 = arith.addf %31, %35 : vector<2x50xf32>
    %37 = vector.extract_strided_slice %20 {offsets = [6, 0], sizes = [2, 20], strides = [1, 1]} : vector<32x20xf32> to vector<2x20xf32>
    %c3_29 = arith.constant 3 : index
    %c0_30 = arith.constant 0 : index
    %c0_31 = arith.constant 0 : index
    %38 = vector.load %arg3[%c3_29, %c0_30, %c0_31] : memref<16x20x50xf32, #tpu.memory_space<vmem>>, vector<1x20x50xf32>
    %39 = vector.shape_cast %38 : vector<1x20x50xf32> to vector<20x50xf32>
    %cst_32 = arith.constant dense<0.000000e+00> : vector<2x50xf32>
    %40 = tpu.matmul %37, %39, %cst_32 {dimension_numbers = #tpu.dot_dimension_numbers<[1], [0], [0], [1], [0, 0, 1, 1], [], []>} : vector<2x20xf32>, vector<20x50xf32>, vector<2x50xf32> -> vector<2x50xf32>
    %41 = arith.addf %36, %40 : vector<2x50xf32>
    %42 = vector.extract_strided_slice %20 {offsets = [8, 0], sizes = [2, 20], strides = [1, 1]} : vector<32x20xf32> to vector<2x20xf32>
    %c4 = arith.constant 4 : index
    %c0_33 = arith.constant 0 : index
    %c0_34 = arith.constant 0 : index
    %43 = vector.load %arg3[%c4, %c0_33, %c0_34] : memref<16x20x50xf32, #tpu.memory_space<vmem>>, vector<1x20x50xf32>
    %44 = vector.shape_cast %43 : vector<1x20x50xf32> to vector<20x50xf32>
    %cst_35 = arith.constant dense<0.000000e+00> : vector<2x50xf32>
    %45 = tpu.matmul %42, %44, %cst_35 {dimension_numbers = #tpu.dot_dimension_numbers<[1], [0], [0], [1], [0, 0, 1, 1], [], []>} : vector<2x20xf32>, vector<20x50xf32>, vector<2x50xf32> -> vector<2x50xf32>
    %46 = arith.addf %41, %45 : vector<2x50xf32>
    %47 = vector.extract_strided_slice %20 {offsets = [10, 0], sizes = [2, 20], strides = [1, 1]} : vector<32x20xf32> to vector<2x20xf32>
    %c5 = arith.constant 5 : index
    %c0_36 = arith.constant 0 : index
    %c0_37 = arith.constant 0 : index
    %48 = vector.load %arg3[%c5, %c0_36, %c0_37] : memref<16x20x50xf32, #tpu.memory_space<vmem>>, vector<1x20x50xf32>
    %49 = vector.shape_cast %48 : vector<1x20x50xf32> to vector<20x50xf32>
    %cst_38 = arith.constant dense<0.000000e+00> : vector<2x50xf32>
    %50 = tpu.matmul %47, %49, %cst_38 {dimension_numbers = #tpu.dot_dimension_numbers<[1], [0], [0], [1], [0, 0, 1, 1], [], []>} : vector<2x20xf32>, vector<20x50xf32>, vector<2x50xf32> -> vector<2x50xf32>
    %51 = arith.addf %46, %50 : vector<2x50xf32>
    %52 = vector.extract_strided_slice %20 {offsets = [12, 0], sizes = [2, 20], strides = [1, 1]} : vector<32x20xf32> to vector<2x20xf32>
    %c6 = arith.constant 6 : index
    %c0_39 = arith.constant 0 : index
    %c0_40 = arith.constant 0 : index
    %53 = vector.load %arg3[%c6, %c0_39, %c0_40] : memref<16x20x50xf32, #tpu.memory_space<vmem>>, vector<1x20x50xf32>
    %54 = vector.shape_cast %53 : vector<1x20x50xf32> to vector<20x50xf32>
    %cst_41 = arith.constant dense<0.000000e+00> : vector<2x50xf32>
    %55 = tpu.matmul %52, %54, %cst_41 {dimension_numbers = #tpu.dot_dimension_numbers<[1], [0], [0], [1], [0, 0, 1, 1], [], []>} : vector<2x20xf32>, vector<20x50xf32>, vector<2x50xf32> -> vector<2x50xf32>
    %56 = arith.addf %51, %55 : vector<2x50xf32>
    %57 = vector.extract_strided_slice %20 {offsets = [14, 0], sizes = [2, 20], strides = [1, 1]} : vector<32x20xf32> to vector<2x20xf32>
    %c7 = arith.constant 7 : index
    %c0_42 = arith.constant 0 : index
    %c0_43 = arith.constant 0 : index
    %58 = vector.load %arg3[%c7, %c0_42, %c0_43] : memref<16x20x50xf32, #tpu.memory_space<vmem>>, vector<1x20x50xf32>
    %59 = vector.shape_cast %58 : vector<1x20x50xf32> to vector<20x50xf32>
    %cst_44 = arith.constant dense<0.000000e+00> : vector<2x50xf32>
    %60 = tpu.matmul %57, %59, %cst_44 {dimension_numbers = #tpu.dot_dimension_numbers<[1], [0], [0], [1], [0, 0, 1, 1], [], []>} : vector<2x20xf32>, vector<20x50xf32>, vector<2x50xf32> -> vector<2x50xf32>
    %61 = arith.addf %56, %60 : vector<2x50xf32>
    %62 = vector.extract_strided_slice %20 {offsets = [16, 0], sizes = [2, 20], strides = [1, 1]} : vector<32x20xf32> to vector<2x20xf32>
    %c8 = arith.constant 8 : index
    %c0_45 = arith.constant 0 : index
    %c0_46 = arith.constant 0 : index
    %63 = vector.load %arg3[%c8, %c0_45, %c0_46] : memref<16x20x50xf32, #tpu.memory_space<vmem>>, vector<1x20x50xf32>
    %64 = vector.shape_cast %63 : vector<1x20x50xf32> to vector<20x50xf32>
    %cst_47 = arith.constant dense<0.000000e+00> : vector<2x50xf32>
    %65 = tpu.matmul %62, %64, %cst_47 {dimension_numbers = #tpu.dot_dimension_numbers<[1], [0], [0], [1], [0, 0, 1, 1], [], []>} : vector<2x20xf32>, vector<20x50xf32>, vector<2x50xf32> -> vector<2x50xf32>
    %66 = arith.addf %61, %65 : vector<2x50xf32>
    %67 = vector.extract_strided_slice %20 {offsets = [18, 0], sizes = [2, 20], strides = [1, 1]} : vector<32x20xf32> to vector<2x20xf32>
    %c9 = arith.constant 9 : index
    %c0_48 = arith.constant 0 : index
    %c0_49 = arith.constant 0 : index
    %68 = vector.load %arg3[%c9, %c0_48, %c0_49] : memref<16x20x50xf32, #tpu.memory_space<vmem>>, vector<1x20x50xf32>
    %69 = vector.shape_cast %68 : vector<1x20x50xf32> to vector<20x50xf32>
    %cst_50 = arith.constant dense<0.000000e+00> : vector<2x50xf32>
    %70 = tpu.matmul %67, %69, %cst_50 {dimension_numbers = #tpu.dot_dimension_numbers<[1], [0], [0], [1], [0, 0, 1, 1], [], []>} : vector<2x20xf32>, vector<20x50xf32>, vector<2x50xf32> -> vector<2x50xf32>
    %71 = arith.addf %66, %70 : vector<2x50xf32>
    %72 = vector.extract_strided_slice %20 {offsets = [20, 0], sizes = [2, 20], strides = [1, 1]} : vector<32x20xf32> to vector<2x20xf32>
    %c10 = arith.constant 10 : index
    %c0_51 = arith.constant 0 : index
    %c0_52 = arith.constant 0 : index
    %73 = vector.load %arg3[%c10, %c0_51, %c0_52] : memref<16x20x50xf32, #tpu.memory_space<vmem>>, vector<1x20x50xf32>
    %74 = vector.shape_cast %73 : vector<1x20x50xf32> to vector<20x50xf32>
    %cst_53 = arith.constant dense<0.000000e+00> : vector<2x50xf32>
    %75 = tpu.matmul %72, %74, %cst_53 {dimension_numbers = #tpu.dot_dimension_numbers<[1], [0], [0], [1], [0, 0, 1, 1], [], []>} : vector<2x20xf32>, vector<20x50xf32>, vector<2x50xf32> -> vector<2x50xf32>
    %76 = arith.addf %71, %75 : vector<2x50xf32>
    %77 = vector.extract_strided_slice %20 {offsets = [22, 0], sizes = [2, 20], strides = [1, 1]} : vector<32x20xf32> to vector<2x20xf32>
    %c11 = arith.constant 11 : index
    %c0_54 = arith.constant 0 : index
    %c0_55 = arith.constant 0 : index
    %78 = vector.load %arg3[%c11, %c0_54, %c0_55] : memref<16x20x50xf32, #tpu.memory_space<vmem>>, vector<1x20x50xf32>
    %79 = vector.shape_cast %78 : vector<1x20x50xf32> to vector<20x50xf32>
    %cst_56 = arith.constant dense<0.000000e+00> : vector<2x50xf32>
    %80 = tpu.matmul %77, %79, %cst_56 {dimension_numbers = #tpu.dot_dimension_numbers<[1], [0], [0], [1], [0, 0, 1, 1], [], []>} : vector<2x20xf32>, vector<20x50xf32>, vector<2x50xf32> -> vector<2x50xf32>
    %81 = arith.addf %76, %80 : vector<2x50xf32>
    %82 = vector.extract_strided_slice %20 {offsets = [24, 0], sizes = [2, 20], strides = [1, 1]} : vector<32x20xf32> to vector<2x20xf32>
    %c12 = arith.constant 12 : index
    %c0_57 = arith.constant 0 : index
    %c0_58 = arith.constant 0 : index
    %83 = vector.load %arg3[%c12, %c0_57, %c0_58] : memref<16x20x50xf32, #tpu.memory_space<vmem>>, vector<1x20x50xf32>
    %84 = vector.shape_cast %83 : vector<1x20x50xf32> to vector<20x50xf32>
    %cst_59 = arith.constant dense<0.000000e+00> : vector<2x50xf32>
    %85 = tpu.matmul %82, %84, %cst_59 {dimension_numbers = #tpu.dot_dimension_numbers<[1], [0], [0], [1], [0, 0, 1, 1], [], []>} : vector<2x20xf32>, vector<20x50xf32>, vector<2x50xf32> -> vector<2x50xf32>
    %86 = arith.addf %81, %85 : vector<2x50xf32>
    %87 = vector.extract_strided_slice %20 {offsets = [26, 0], sizes = [2, 20], strides = [1, 1]} : vector<32x20xf32> to vector<2x20xf32>
    %c13 = arith.constant 13 : index
    %c0_60 = arith.constant 0 : index
    %c0_61 = arith.constant 0 : index
    %88 = vector.load %arg3[%c13, %c0_60, %c0_61] : memref<16x20x50xf32, #tpu.memory_space<vmem>>, vector<1x20x50xf32>
    %89 = vector.shape_cast %88 : vector<1x20x50xf32> to vector<20x50xf32>
    %cst_62 = arith.constant dense<0.000000e+00> : vector<2x50xf32>
    %90 = tpu.matmul %87, %89, %cst_62 {dimension_numbers = #tpu.dot_dimension_numbers<[1], [0], [0], [1], [0, 0, 1, 1], [], []>} : vector<2x20xf32>, vector<20x50xf32>, vector<2x50xf32> -> vector<2x50xf32>
    %91 = arith.addf %86, %90 : vector<2x50xf32>
    %92 = vector.extract_strided_slice %20 {offsets = [28, 0], sizes = [2, 20], strides = [1, 1]} : vector<32x20xf32> to vector<2x20xf32>
    %c14 = arith.constant 14 : index
    %c0_63 = arith.constant 0 : index
    %c0_64 = arith.constant 0 : index
    %93 = vector.load %arg3[%c14, %c0_63, %c0_64] : memref<16x20x50xf32, #tpu.memory_space<vmem>>, vector<1x20x50xf32>
    %94 = vector.shape_cast %93 : vector<1x20x50xf32> to vector<20x50xf32>
    %cst_65 = arith.constant dense<0.000000e+00> : vector<2x50xf32>
    %95 = tpu.matmul %92, %94, %cst_65 {dimension_numbers = #tpu.dot_dimension_numbers<[1], [0], [0], [1], [0, 0, 1, 1], [], []>} : vector<2x20xf32>, vector<20x50xf32>, vector<2x50xf32> -> vector<2x50xf32>
    %96 = arith.addf %91, %95 : vector<2x50xf32>
    %97 = vector.extract_strided_slice %20 {offsets = [30, 0], sizes = [2, 20], strides = [1, 1]} : vector<32x20xf32> to vector<2x20xf32>
    %c15 = arith.constant 15 : index
    %c0_66 = arith.constant 0 : index
    %c0_67 = arith.constant 0 : index
    %98 = vector.load %arg3[%c15, %c0_66, %c0_67] : memref<16x20x50xf32, #tpu.memory_space<vmem>>, vector<1x20x50xf32>
    %99 = vector.shape_cast %98 : vector<1x20x50xf32> to vector<20x50xf32>
    %cst_68 = arith.constant dense<0.000000e+00> : vector<2x50xf32>
    %100 = tpu.matmul %97, %99, %cst_68 {dimension_numbers = #tpu.dot_dimension_numbers<[1], [0], [0], [1], [0, 0, 1, 1], [], []>} : vector<2x20xf32>, vector<20x50xf32>, vector<2x50xf32> -> vector<2x50xf32>
    %101 = arith.addf %96, %100 : vector<2x50xf32>
    %c0_69 = arith.constant 0 : index
    %c0_70 = arith.constant 0 : index
    %102 = vector.load %arg4[%c0_69, %c0_70] : memref<1x50xf32, #tpu.memory_space<vmem>>, vector<1x50xf32>
    %103 = vector.broadcast %102 : vector<1x50xf32> to vector<2x50xf32>
    %104 = arith.addf %101, %103 : vector<2x50xf32>
    %cst_71 = arith.constant 0.000000e+00 : f32
    %105 = vector.broadcast %cst_71 : f32 to vector<2x50xf32>
    %106 = arith.maximumf %104, %105 : vector<2x50xf32>
    %c0_72 = arith.constant 0 : index
    %c0_73 = arith.constant 0 : index
    %107 = vector.load %arg5[%c0_72, %c0_73] : memref<50x10xf32, #tpu.memory_space<vmem>>, vector<50x10xf32>
    %cst_74 = arith.constant dense<0.000000e+00> : vector<2x10xf32>
    %108 = tpu.matmul %106, %107, %cst_74 {dimension_numbers = #tpu.dot_dimension_numbers<[1], [0], [0], [1], [0, 0, 1, 1], [], []>} : vector<2x50xf32>, vector<50x10xf32>, vector<2x10xf32> -> vector<2x10xf32>
    %c0_75 = arith.constant 0 : index
    %c0_76 = arith.constant 0 : index
    %109 = vector.load %arg6[%c0_75, %c0_76] : memref<1x10xf32, #tpu.memory_space<vmem>>, vector<1x10xf32>
    %110 = vector.broadcast %109 : vector<1x10xf32> to vector<2x10xf32>
    %111 = arith.addf %108, %110 : vector<2x10xf32>
    %c0_77 = arith.constant 0 : index
    %c0_78 = arith.constant 0 : index
    %112 = vector.load %arg7[%c0_77, %c0_78] : memref<2x10xf32, #tpu.memory_space<vmem>>, vector<2x10xf32>
    tpu.vector_store %arg7[%c0_77, %c0_78], %111 {strides = array<i32>} : memref<2x10xf32, #tpu.memory_space<vmem>>, vector<2x10xf32>,
    return
  }
}

</mosaic_0001>

<bundles_post_ra>
// kernel: lenet_forward.2
= control target key start
LH: loop header
LB: loop body
LE: loop exit
PB: predicated region body
PF: predicated region fallthrough
CT: control target
= control target key end

     0   :  { %vm35_vm0 = vcmask 1040384   ;;  %v989_v3 = vmov 0.0   ;;  %v990_v8 = vmov 0   ;;  %vm991_vm1 = vmmov 1   ;;  %s1267_s0 = inlined_call_operand.vmem [shape: f32[4,25,288], index: 0, kind: input, shape index: {}]   ;;  %s1268_s1 = inlined_call_operand.vmem [shape: f32[10,25], index: 1, kind: input, shape index: {}]   ;;  %s1269_s2 = inlined_call_operand.vmem [shape: f32[10,1], index: 2, kind: input, shape index: {}]   ;;  %s1270_s3 = inlined_call_operand.vmem [shape: f32[10,288], index: 3, kind: output, shape index: {}]  }
   0x1   :  { %v17_v0 = vld [vmem:[%s1267_s0 + $0x8] sm:$0xff]  ;;  %v20_v1 = vld [vmem:[%s1267_s0 + $0x20] sm:$0xff]  ;;  %v18_v2 = vld [vmem:[%s1267_s0 + $0x10] sm:$0xff]  ;;  %109 = vmatprep.mubr.f32.mxu0 %v989_v3  ;;  %988 = vset.pattern.permute.xlu0 %v990_v8  ;;  %vm28_vm3 = vcmask 203776   ;;  %vm767_vm4 = vcmask 254976   ;;  %vm763_vm5 = vcmask 261120  }
   0x2   :  { %v905_v4 = vpack.c.bf16 %v20_v1, %v17_v0  ;;  %v21_v5 = vld [vmem:[%s1267_s0 + $0x28] sm:$0xff]  ;;  %v16_v6 = vld [vmem:[%s1267_s0] sm:$0xff]  ;;  %v19_v7 = vld [vmem:[%s1267_s0 + $0x18] sm:$0xff] }
   0x3   :  { %v915_v9 = vpack.c.bf16 %v21_v5, %v18_v2  ;;  %v907_v10 = vpack.c.bf16 %v19_v7, %v16_v6  ;;  %v23_v11 = vld [vmem:[%s1267_s0 + $0x38] sm:$0xff]  ;;  %v26_v12 = vld [vmem:[%s1267_s0 + $0x50] sm:$0x1]  ;;  %vm1038_vm2 = vmpackc.low %vm35_vm0, %vm991_vm1 }
   0x4   :  { %906 = vmatprep.subr.bf16.mxu0 %v905_v4  ;;  %v909_v14 = vpack.c.bf16 %v26_v12, %v23_v11  ;;  %v24_v15 = vld [vmem:[%s1267_s0 + $0x40] sm:$0xff]  ;;  %v27_v16 = vld [vmem:[%s1267_s0 + $0x58] sm:$0x1]  ;;  %v22_v17 = vld [vmem:[%s1267_s0 + $0x30] sm:$0xff] }
   0x5   :  { %916 = vmatprep.subr.bf16.mxu1 %v915_v9  ;;  %908 = vmatpush1.bf16.msra.mxu0 %v907_v10  ;;  %v919_v18 = vpack.c.bf16 %v27_v16, %v24_v15  ;;  %v25_v19 = vld [vmem:[%s1267_s0 + $0x48] sm:$0x1]  ;;  %v1057_v20 = vld [vmem:[%s1268_s1] sm:$0xff]  ;;  %v782_v24 = vld [vmem:[%s1267_s0 + $0x70] sm:$0xff] }
   0x6   :  { %v781_v21 = vld [vmem:[%s1267_s0 + $0x68] sm:$0xff]  ;;  %918 = vmatpush3.bf16.msra.mxu1 %v915_v9  ;;  %911 = vmatprep.subr.msk.bf16.mxu0 %vm1038_vm2, %v909_v14  ;;  %v912_v22 = vpack.c.bf16 %v25_v19, %v22_v17  ;;  %v784_v23 = vld [vmem:[%s1267_s0 + $0x80] sm:$0xff]  ;;  %v783_v29 = vld [vmem:[%s1267_s0 + $0x78] sm:$0xff] }
   0x7   :  { %v785_v25 = vld [vmem:[%s1267_s0 + $0x88] sm:$0xff]  ;;  %921 = vmatprep.subr.msk.bf16.mxu1 %vm1038_vm2, %v919_v18  ;;  %869 = vmatprep.mubr.msk.f32.mxu1 %vm28_vm3, %v1057_v20  ;;  %v925_v26 = vpack.c.bf16 %v784_v23, %v781_v21  ;;  %v780_v28 = vld [vmem:[%s1267_s0 + $0x60] sm:$0xff]  ;;  %v787_v30 = vld [vmem:[%s1267_s0 + $0x98] sm:$0xff] }
   0x8   :  { %v935_v27 = vpack.c.bf16 %v785_v25, %v782_v24  ;;  %v790_v31 = vld [vmem:[%s1267_s0 + $0xb0] sm:$0x1]  ;;  %v788_v32 = vld [vmem:[%s1267_s0 + $0xa0] sm:$0xff]  ;;  %v927_v33 = vpack.c.bf16 %v783_v29, %v780_v28  ;;  %v791_v34 = vld [vmem:[%s1267_s0 + $0xb8] sm:$0x1] }
   0x9   :  { %914 = vmatpush1.bf16.msk.msra.mxu0 %vm1038_vm2, %v912_v22  ;;  %v1102_v35 = vld [vmem:[%s1268_s1 + $0x8] sm:$0x3]  ;;  %v786_v36 = vld [vmem:[%s1267_s0 + $0x90] sm:$0xff]  ;;  %v929_v38 = vpack.c.bf16 %v790_v31, %v787_v30  ;;  %v939_v39 = vpack.c.bf16 %v791_v34, %v788_v32  ;;  %v803_v41 = vld [vmem:[%s1267_s0 + $0xe0] sm:$0xff] }
   0xa   :  { %924 = vmatpush3.bf16.msk.msra.mxu1 %vm1038_vm2, %v919_v18  ;;  %926 = vmatprep.subr.bf16.mxu0 %v925_v26  ;;  %v789_v37 = vld [vmem:[%s1267_s0 + $0xa8] sm:$0x1]  ;;  %v801_v42 = vld [vmem:[%s1267_s0 + $0xd0] sm:$0xff]  ;;  %v799_v46 = vld [vmem:[%s1267_s0 + $0xc0] sm:$0xff] }
   0xb   :  { %936 = vmatprep.subr.bf16.mxu1 %v935_v27  ;;  %v800_v40 = vld [vmem:[%s1267_s0 + $0xc8] sm:$0xff]  ;;  %v932_v44 = vpack.c.bf16 %v789_v37, %v786_v36  ;;  %v802_v47 = vld [vmem:[%s1267_s0 + $0xd8] sm:$0xff]  ;;  %v809_v50 = vld [vmem:[%s1267_s0 + $0x110] sm:$0x1] }
   0xc   :  { %775 = vmatmul.mubr.msk.f32.vlgmr.msra.gmra.mrb[0].mxu0 %vm28_vm3, %v1057_v20  ;;  %v804_v43 = vld [vmem:[%s1267_s0 + $0xe8] sm:$0xff]  ;;  %v945_v45 = vpack.c.bf16 %v803_v41, %v800_v40  ;;  %v806_v49 = vld [vmem:[%s1267_s0 + $0xf8] sm:$0xff]  ;;  %v807_v51 = vld [vmem:[%s1267_s0 + $0x100] sm:$0xff]  ;;  %v947_v53 = vpack.c.bf16 %v802_v47, %v799_v46 }
   0xd   :  { %870 = vmatmul.mubr.msk.f32.vlgmr.msra.gmra.mrb[0].mxu1 %vm28_vm3, %v1102_v35  ;;  %928 = vmatpush1.bf16.msra.mxu0 %v927_v33  ;;  %v955_v48 = vpack.c.bf16 %v804_v43, %v801_v42  ;;  %v810_v52 = vld [vmem:[%s1267_s0 + $0x118] sm:$0x1]  ;;  %v805_v54 = vld [vmem:[%s1267_s0 + $0xf0] sm:$0xff]  ;;  %v808_v55 = vld [vmem:[%s1267_s0 + $0x108] sm:$0x1]  ;;  %v949_v57 = vpack.c.bf16 %v809_v50, %v806_v49 }
   0xe   :  { %938 = vmatpush3.bf16.msra.mxu1 %v935_v27  ;;  %115 = vmatprep.mubr.f32.mxu0 %v989_v3  ;;  %v737_v56 = vld [vmem:[%s1269_s2] sm:$0xff]  ;;  %v959_v58 = vpack.c.bf16 %v810_v52, %v807_v51  ;;  %v819_v59 = vld [vmem:[%s1267_s0 + $0x128] sm:$0xff]  ;;  %v820_v61 = vld [vmem:[%s1267_s0 + $0x130] sm:$0xff]  ;;  %v952_v63 = vpack.c.bf16 %v808_v55, %v805_v54 }
   0xf   :  { %931 = vmatprep.subr.msk.bf16.mxu0 %vm1038_vm2, %v929_v38  ;;  %941 = vmatprep.subr.msk.bf16.mxu1 %vm1038_vm2, %v939_v39  ;;  %v822_v60 = vld [vmem:[%s1267_s0 + $0x140] sm:$0xff]  ;;  %v823_v62 = vld [vmem:[%s1267_s0 + $0x148] sm:$0xff]  ;;  %v821_v2 = vld [vmem:[%s1267_s0 + $0x138] sm:$0xff] }
  0x10   :  { %776 = vmatmul.mubr.msk.f32.gmra.mrb[2].mxu0 %vm28_vm3, %v1102_v35  ;;  %880 = vmatprep.mubr.msk.f32.mxu1 %vm28_vm3, %v1057_v20  ;;  %v965_v0 = vpack.c.bf16 %v822_v60, %v819_v59  ;;  %v818_v1 = vld [vmem:[%s1267_s0 + $0x120] sm:$0xff]  ;;  %v975_v4 = vpack.c.bf16 %v823_v62, %v820_v61  ;;  %v825_v5 = vld [vmem:[%s1267_s0 + $0x158] sm:$0xff]  ;;  %v828_v6 = vld [vmem:[%s1267_s0 + $0x170] sm:$0x1] }
  0x11   :  { %934 = vmatpush1.bf16.msk.msra.mxu0 %vm1038_vm2, %v932_v44  ;;  %283 = vmatprep.mubr.f32.mxu0 %v989_v3  ;;  %v826_v7 = vld [vmem:[%s1267_s0 + $0x160] sm:$0xff]  ;;  %v829_v8 = vld [vmem:[%s1267_s0 + $0x178] sm:$0x1]  ;;  %v738_v9 = vld [vmem:[%s1269_s2 + $0x8] sm:$0x3]  ;;  %v967_v10 = vpack.c.bf16 %v821_v2, %v818_v1  ;;  %v969_v14 = vpack.c.bf16 %v828_v6, %v825_v5 }
  0x12   :  { %944 = vmatpush3.bf16.msk.msra.mxu1 %vm1038_vm2, %v939_v39  ;;  %946 = vmatprep.subr.bf16.mxu0 %v945_v45  ;;  %v824_v11 = vld [vmem:[%s1267_s0 + $0x150] sm:$0xff]  ;;  %v827_v12 = vld [vmem:[%s1267_s0 + $0x168] sm:$0x1]  ;;  %v979_v15 = vpack.c.bf16 %v829_v8, %v826_v7 }
  0x13   :  { %956 = vmatprep.subr.bf16.mxu1 %v955_v48  ;;  %741 = vperm.xlu0 %988, %v737_v56   ;;  %v972_v16 = vpack.c.bf16 %v827_v12, %v824_v11 }
  0x14   :  { %794 = vmatmul.mubr.msk.f32.vlgmr.msra.gmra.mrb[4].mxu0 %vm28_vm3, %v1057_v20 }
  0x15   :  { %881 = vmatmul.mubr.msk.f32.vlgmr.msra.gmra.mrb[2].mxu1 %vm28_vm3, %v1102_v35  ;;  %948 = vmatpush1.bf16.msra.mxu0 %v947_v53 }
  0x16   :  { %958 = vmatpush3.bf16.msra.mxu1 %v955_v48  ;;  %289 = vmatprep.mubr.f32.mxu0 %v989_v3 }
  0x17   :  { %951 = vmatprep.subr.msk.bf16.mxu0 %vm1038_vm2, %v949_v57  ;;  %961 = vmatprep.subr.msk.bf16.mxu1 %vm1038_vm2, %v959_v58 }
  0x18   :  { %795 = vmatmul.mubr.msk.f32.gmra.mrb[6].mxu0 %vm28_vm3, %v1102_v35  ;;  %891 = vmatprep.mubr.msk.f32.mxu1 %vm28_vm3, %v1057_v20 }
  0x19   :  { %954 = vmatpush1.bf16.msk.msra.mxu0 %vm1038_vm2, %v952_v63  ;;  %463 = vmatprep.mubr.f32.mxu0 %v989_v3 }
  0x1a   :  { %964 = vmatpush3.bf16.msk.msra.mxu1 %vm1038_vm2, %v959_v58  ;;  %966 = vmatprep.subr.bf16.mxu0 %v965_v0 }
  0x1b   :  { %976 = vmatprep.subr.bf16.mxu1 %v975_v4  ;;  %746 = vperm.xlu0 %988, %v738_v9  }
  0x1c   :  { %813 = vmatmul.mubr.msk.f32.vlgmr.msra.gmra.mrb[8].mxu0 %vm28_vm3, %v1057_v20 }
  0x1d   :  { %892 = vmatmul.mubr.msk.f32.vlgmr.msra.gmra.mrb[4].mxu1 %vm28_vm3, %v1102_v35  ;;  %968 = vmatpush1.bf16.msra.mxu0 %v967_v10 }
  0x1e   :  { %978 = vmatpush3.bf16.msra.mxu1 %v975_v4  ;;  %469 = vmatprep.mubr.f32.mxu0 %v989_v3 }
  0x1f   :  { %971 = vmatprep.subr.msk.bf16.mxu0 %vm1038_vm2, %v969_v14  ;;  %981 = vmatprep.subr.msk.bf16.mxu1 %vm1038_vm2, %v979_v15 }
  0x20   :  { %814 = vmatmul.mubr.msk.f32.gmra.mrb[10].mxu0 %vm28_vm3, %v1102_v35  ;;  %902 = vmatprep.mubr.msk.f32.mxu1 %vm28_vm3, %v1057_v20 }
  0x21   :  { %974 = vmatpush1.bf16.msk.msra.mxu0 %vm1038_vm2, %v972_v16  ;;  %643 = vmatprep.mubr.f32.mxu0 %v989_v3 }
  0x22   :  { %984 = vmatpush3.bf16.msk.msra.mxu1 %vm1038_vm2, %v979_v15 }
  0x24   :  { %832 = vmatmul.mubr.msk.f32.vlgmr.msra.gmra.mrb[12].mxu0 %vm28_vm3, %v1057_v20 }
  0x25   :  { %903 = vmatmul.mubr.msk.f32.vlgmr.msra.gmra.mrb[6].mxu1 %vm28_vm3, %v1102_v35  ;;  %649 = vmatprep.mubr.f32.mxu0 %v989_v3 }
  0x28   :  { %833 = vmatmul.mubr.msk.f32.gmra.mrb[14].mxu0 %vm28_vm3, %v1102_v35 }
  0x92   :  { %v742_v40 = vpop.permute.xlu0 %741 }
  0x9a   :  { %v747_v47 = vpop.permute.xlu0 %746 }
  0xdf   :  { %v111_v17 = vpop.f32.mrb[0].mxu0 }
  0xe0   :  { %v113_v18 = vpop.f32.mrb[1].mxu0  ;;  %v871_v19 = vpop.f32.mrb[0].mxu1 }
  0xe1   :  { %v188_v21 = vpop.f32.mrb[1].mxu1 }
  0xe3   :  { %v117_v22 = vpop.f32.mrb[2].mxu0 }
  0xe4   :  { %v119_v23 = vpop.f32.mrb[3].mxu0 }
  0xe7   :  { %v285_v24 = vpop.f32.mrb[4].mxu0 }
  0xe8   :  { %v371_v13 = vmax.f32 %v111_v17, %v285_v24  ;;  %v882_v25 = vpop.f32.mrb[2].mxu1  ;;  %v287_v26 = vpop.f32.mrb[5].mxu0 }
  0xe9   :  { %v376_v27 = vmax.f32 %v871_v19, %v882_v25  ;;  %v372_v20 = vmax.f32 %v113_v18, %v287_v26  ;;  %v362_v28 = vpop.f32.mrb[3].mxu1 }
  0xea   :  { %v373_v29 = vmax.f32 %v188_v21, %v362_v28 }
  0xeb   :  { %v291_v30 = vpop.f32.mrb[6].mxu0 }
  0xec   :  { %v374_v31 = vmax.f32 %v117_v22, %v291_v30  ;;  %v293_v3 = vpop.f32.mrb[7].mxu0 }
  0xed   :  { %v375_v32 = vmax.f32 %v119_v23, %v293_v3 }
  0xef   :  { %v465_v33 = vpop.f32.mrb[8].mxu0 }
  0xf0   :  { %v551_v34 = vmax.f32 %v371_v13, %v465_v33  ;;  %v893_v35 = vpop.f32.mrb[4].mxu1  ;;  %v467_v36 = vpop.f32.mrb[9].mxu0 }
  0xf1   :  { %v556_v37 = vmax.f32 %v376_v27, %v893_v35  ;;  %v552_v38 = vmax.f32 %v372_v20, %v467_v36  ;;  %v542_v39 = vpop.f32.mrb[5].mxu1 }
  0xf2   :  { %v553_v41 = vmax.f32 %v373_v29, %v542_v39 }
  0xf3   :  { %v471_v42 = vpop.f32.mrb[10].mxu0 }
  0xf4   :  { %v554_v43 = vmax.f32 %v374_v31, %v471_v42  ;;  %v473_v44 = vpop.f32.mrb[11].mxu0 }
  0xf5   :  { %v555_v45 = vmax.f32 %v375_v32, %v473_v44 }
  0xf7   :  { %v645_v46 = vpop.f32.mrb[12].mxu0 }
  0xf8   :  { %v731_v48 = vmax.f32 %v551_v34, %v645_v46  ;;  %v904_v49 = vpop.f32.mrb[6].mxu1  ;;  %v647_v50 = vpop.f32.mrb[13].mxu0 }
  0xf9   :  { %v736_v51 = vmax.f32 %v556_v37, %v904_v49  ;;  %v732_v52 = vmax.f32 %v552_v38, %v647_v50  ;;  %v722_v53 = vpop.f32.mrb[7].mxu1 }
  0xfa   :  { %v749_v54 = vadd.f32 %v742_v40, %v731_v48  ;;  %v733_v55 = vmax.f32 %v553_v41, %v722_v53 }
  0xfb   :  { %v750_v56 = vadd.f32 %v742_v40, %v732_v52  ;;  %v754_v57 = vadd.f32 %v747_v47, %v736_v51  ;;  %v651_v58 = vpop.f32.mrb[14].mxu0 }
  0xfc   :  { %v755_v59 = vmax.f32 %v749_v54, 0.0  ;;  %v751_v60 = vadd.f32 %v742_v40, %v733_v55  ;;  %v734_v61 = vmax.f32 %v554_v43, %v651_v58  ;;  %v653_v62 = vpop.f32.mrb[15].mxu0 }
  0xfd   :  { %v756_v63 = vmax.f32 %v750_v56, 0.0  ;;  %v760_v0 = vmax.f32 %v754_v57, 0.0  ;;  %v735_v1 = vmax.f32 %v555_v45, %v653_v62 }
  0xfe   :  { %761 = vst [vmem:[%s1270_s3] sm:$0xff] %v755_v59  ;;  %v757_v2 = vmax.f32 %v751_v60, 0.0  ;;  %v752_v4 = vadd.f32 %v747_v47, %v734_v61 }
  0xff   :  { %762 = vst [vmem:[%s1270_s3 + $0x8] sm:$0xff] %v756_v63  ;;  %768 = vst.msk [vmem:[%s1270_s3 + $0x28] sm:$0x3] %vm767_vm4, %v760_v0  ;;  %v753_v5 = vadd.f32 %v747_v47, %v735_v1 }
 0x100   :  { %764 = vst.msk [vmem:[%s1270_s3 + $0x10] sm:$0xff] %vm763_vm5, %v757_v2  ;;  %v758_v6 = vmax.f32 %v752_v4, 0.0 }
 0x101   :  { %v759_v7 = vmax.f32 %v753_v5, 0.0 }
 0x102   :  { %765 = vst [vmem:[%s1270_s3 + $0x18] sm:$0x3] %v758_v6 }
 0x103   :  { %766 = vst [vmem:[%s1270_s3 + $0x20] sm:$0x3] %v759_v7 }

// kernel: lenet_forward.3
= control target key start
LH: loop header
LB: loop body
LE: loop exit
PB: predicated region body
PF: predicated region fallthrough
CT: control target
= control target key end

     0   :  { %vm67_vm0 = vcmask 998400   ;;  %s3359_s0 = inlined_call_operand.vmem [shape: f32[4,32,250], index: 0, kind: input, shape index: {}]   ;;  %s3360_s1 = inlined_call_operand.vmem [shape: f32[250,20], index: 1, kind: input, shape index: {}]   ;;  %s3361_s2 = inlined_call_operand.vmem [shape: f32[1,20], index: 2, kind: input, shape index: {}]   ;;  %s3362_s3 = inlined_call_operand.vmem [shape: f32[16,20,50], index: 3, kind: input, shape index: {}]   ;;  %s3363_s4 = inlined_call_operand.vmem [shape: f32[1,50], index: 4, kind: input, shape index: {}]   ;;  %s3364_s5 = inlined_call_operand.vmem [shape: f32[50,10], index: 5, kind: input, shape index: {}]   ;;  %s3365_s6 = inlined_call_operand.vmem [shape: f32[1,10], index: 6, kind: input, shape index: {}]   ;;  %s3366_s7 = inlined_call_operand.hbm [shape: f32[2,10], index: 7, kind: output, shape index: {}]  }
   0x1   :  { %v43_v0 = vld [vmem:[%s3360_s1 + $0x80] sm:$0xff]  ;;  %v44_v1 = vld [vmem:[%s3360_s1 + $0x88] sm:$0xff]  ;;  %v45_v5 = vld [vmem:[%s3360_s1 + $0x90] sm:$0xff] }
   0x2   :  { %v27_v2 = vld [vmem:[%s3360_s1] sm:$0xff]  ;;  %v2732_v3 = vpack.c.bf16 %v44_v1, %v43_v0  ;;  %v28_v4 = vld [vmem:[%s3360_s1 + $0x8] sm:$0xff]  ;;  %v46_v6 = vld [vmem:[%s3360_s1 + $0x98] sm:$0xff] }
   0x3   :  { %v2743_v7 = vpack.c.bf16 %v28_v4, %v27_v2  ;;  %v2745_v8 = vpack.c.bf16 %v46_v6, %v45_v5  ;;  %v29_v9 = vld [vmem:[%s3360_s1 + $0x10] sm:$0xff]  ;;  %v30_v10 = vld [vmem:[%s3360_s1 + $0x18] sm:$0xff]  ;;  %v47_v11 = vld [vmem:[%s3360_s1 + $0xa0] sm:$0xff] }
   0x4   :  { %2461 = vmatprep.subr.bf16.mxu0 %v2732_v3  ;;  %2494 = vmatprep.subr.bf16.mxu1 %v2732_v3  ;;  %v48_v12 = vld [vmem:[%s3360_s1 + $0xa8] sm:$0xff]  ;;  %v2763_v13 = vpack.c.bf16 %v30_v10, %v29_v9  ;;  %v31_v15 = vld [vmem:[%s3360_s1 + $0x20] sm:$0xff]  ;;  %v49_v17 = vld [vmem:[%s3360_s1 + $0xb0] sm:$0xff] }
   0x5   :  { %2463 = vmatpush3.bf16.msra.mxu0 %v2743_v7  ;;  %2496 = vmatpush3.bf16.msra.mxu1 %v2743_v7  ;;  %v2767_v14 = vpack.c.bf16 %v48_v12, %v47_v11  ;;  %v32_v16 = vld [vmem:[%s3360_s1 + $0x28] sm:$0xff]  ;;  %v50_v18 = vld [vmem:[%s3360_s1 + $0xb8] sm:$0xff]  ;;  %v33_v21 = vld [vmem:[%s3360_s1 + $0x30] sm:$0xff] }
   0x6   :  { %2465 = vmatprep.subr.bf16.mxu0 %v2745_v8  ;;  %2498 = vmatprep.subr.bf16.mxu1 %v2745_v8  ;;  %v2783_v19 = vpack.c.bf16 %v32_v16, %v31_v15  ;;  %v2787_v20 = vpack.c.bf16 %v50_v18, %v49_v17  ;;  %v34_v22 = vld [vmem:[%s3360_s1 + $0x38] sm:$0xff]  ;;  %v51_v23 = vld [vmem:[%s3360_s1 + $0xc0] sm:$0xff]  ;;  %v52_v24 = vld [vmem:[%s3360_s1 + $0xc8] sm:$0xff] }
   0x7   :  { %v60_v25 = vld [vmem:[%s3359_s0 + $0x8] sm:$0xff]  ;;  %v2809_v27 = vpack.c.bf16 %v34_v22, %v33_v21  ;;  %v2813_v28 = vpack.c.bf16 %v52_v24, %v51_v23  ;;  %v35_v29 = vld [vmem:[%s3360_s1 + $0x40] sm:$0xff]  ;;  %v53_v31 = vld [vmem:[%s3360_s1 + $0xd0] sm:$0xff] }
   0x8   :  { %v1931_v26 = vld [vmem:[%s3359_s0 + $0x48] sm:$0xff]  ;;  %v54_v32 = vld [vmem:[%s3360_s1 + $0xd8] sm:$0xff]  ;;  %1926 = vmatprep.mubr.msk.f32.mxu0 %vm67_vm0, %v60_v25  ;;  %v37_v35 = vld [vmem:[%s3360_s1 + $0x50] sm:$0xff] }
   0x9   :  { %2467 = vmatpush3.bf16.msra.mxu0 %v2763_v13  ;;  %2500 = vmatpush3.bf16.msra.mxu1 %v2763_v13  ;;  %v36_v30 = vld [vmem:[%s3360_s1 + $0x48] sm:$0xff]  ;;  %v2835_v34 = vpack.c.bf16 %v54_v32, %v53_v31  ;;  %v38_v36 = vld [vmem:[%s3360_s1 + $0x58] sm:$0xff]  ;;  %v55_v37 = vld [vmem:[%s3360_s1 + $0xe0] sm:$0xff] }
   0xa   :  { %2469 = vmatprep.subr.bf16.mxu0 %v2767_v14  ;;  %2502 = vmatprep.subr.bf16.mxu1 %v2767_v14  ;;  %v2831_v33 = vpack.c.bf16 %v36_v30, %v35_v29  ;;  %v56_v38 = vld [vmem:[%s3360_s1 + $0xe8] sm:$0xff]  ;;  %v2851_v39 = vpack.c.bf16 %v38_v36, %v37_v35  ;;  %v39_v41 = vld [vmem:[%s3360_s1 + $0x60] sm:$0xff] }
   0xb   :  { %1939 = vmatprep.mubr.msk.f32.mxu1 %vm67_vm0, %v1931_v26  ;;  %v2855_v40 = vpack.c.bf16 %v56_v38, %v55_v37  ;;  %v40_v42 = vld [vmem:[%s3360_s1 + $0x68] sm:$0xff] }
   0xd   :  { %2471 = vmatpush3.bf16.msra.mxu0 %v2783_v19  ;;  %2504 = vmatpush3.bf16.msra.mxu1 %v2783_v19 }
   0xe   :  { %2473 = vmatprep.subr.bf16.mxu0 %v2787_v20  ;;  %2506 = vmatprep.subr.bf16.mxu1 %v2787_v20 }
  0x11   :  { %2475 = vmatpush3.bf16.msra.mxu0 %v2809_v27  ;;  %2508 = vmatpush3.bf16.msra.mxu1 %v2809_v27 }
  0x12   :  { %2477 = vmatprep.subr.bf16.mxu0 %v2813_v28  ;;  %2510 = vmatprep.subr.bf16.mxu1 %v2813_v28 }
  0x15   :  { %2479 = vmatpush3.bf16.msra.mxu0 %v2831_v33  ;;  %2512 = vmatpush3.bf16.msra.mxu1 %v2831_v33 }
  0x16   :  { %2481 = vmatprep.subr.bf16.mxu0 %v2835_v34  ;;  %2514 = vmatprep.subr.bf16.mxu1 %v2835_v34 }
  0x17   :  { %12 = vsyncpa [#allocation3], 0  ;;  %v57_v43 = vld [vmem:[%s3360_s1 + $0xf0] sm:$0xff]  ;;  %v58_v44 = vld [vmem:[%s3360_s1 + $0xf8] sm:$0x3]  ;;  %vm80_vm1 = vcmask 1041408   ;;  %v2871_v45 = vpack.c.bf16 %v40_v42, %v39_v41 }
  0x18   :  { %v2875_v46 = vpack.c.bf16 %v58_v44, %v57_v43  ;;  %v41_v47 = vld [vmem:[%s3360_s1 + $0x70] sm:$0xff]  ;;  %v42_v48 = vld [vmem:[%s3360_s1 + $0x78] sm:$0xff]  ;;  %vm2678_vm2 = vmmov 1   ;;  %v59_v51 = vld [vmem:[%s3359_s0] sm:$0xff]  ;;  %v2680_v24 = vmov 0.0   ;;  %vm526_vm4 = vcmask 1043456  }
  0x19   :  { %2483 = vmatpush3.bf16.msra.mxu0 %v2851_v39  ;;  %2516 = vmatpush3.bf16.msra.mxu1 %v2851_v39  ;;  %vm2884_vm3 = vmpackc.low %vm80_vm1, %vm2678_vm2  ;;  %v2890_v50 = vpack.c.bf16 %v42_v48, %v41_v47  ;;  %v1930_v52 = vld [vmem:[%s3359_s0 + $0x40] sm:$0xff]  ;;  %v62_v53 = vld [vmem:[%s3359_s0 + $0x18] sm:$0xff]  ;;  %vm2681_vm5 = vmmov 0   ;;  %vm523_vm6 = vcmask 162816   ;;  %vm1832_vm7 = vcmask 408576   ;;  %s2682_s20 = smov [#allocation2]  }
  0x1a   :  { %2485 = vmatprep.subr.bf16.mxu0 %v2855_v40  ;;  %2518 = vmatprep.subr.bf16.mxu1 %v2855_v40  ;;  %v1933_v54 = vld [vmem:[%s3359_s0 + $0x58] sm:$0xff]  ;;  %v61_v55 = vld [vmem:[%s3359_s0 + $0x10] sm:$0xff]  ;;  %v64_v57 = vld [vmem:[%s3359_s0 + $0x28] sm:$0xff]  ;;  %s1917_s21 = sshll.u32 %s2682_s20, 4  ;;  %vm1909_vm8 = vcmask 74752   ;;  %s1918_s21 = int_to_ptr.vmem [resolvable:$true] %s1917_s21 }
  0x1b   :  { %v1932_v56 = vld [vmem:[%s3359_s0 + $0x50] sm:$0xff]  ;;  %v1935_v58 = vld [vmem:[%s3359_s0 + $0x68] sm:$0xff]  ;;  %v63_v59 = vld [vmem:[%s3359_s0 + $0x20] sm:$0xff]  ;;  %s2654_s22 = scalar_lea.vmem %s1918_s21, 32  ;;  %p2659_p1 = scmp.lt.s32.totalorder %s1918_s21, %s1918_s21 }
  0x1c   :  { %v1934_v60 = vld [vmem:[%s3359_s0 + $0x60] sm:$0xff]  ;;  %v66_v61 = vld [vmem:[%s3359_s0 + $0x38] sm:$0xff]  ;;  %v65_v63 = vld [vmem:[%s3359_s0 + $0x30] sm:$0xff]  ;;  %p2655_p0 = scmp.ne.s32.totalorder %s1918_s21, %s2654_s22  ;;  %p2660_p2 = scmp.lt.s32.totalorder %s2654_s22, %s2654_s22 }
  0x1d   :  { %2487 = vmatpush3.bf16.msra.mxu0 %v2871_v45  ;;  %2520 = vmatpush3.bf16.msra.mxu1 %v2871_v45  ;;  %v1937_v62 = vld [vmem:[%s3359_s0 + $0x78] sm:$0xff]  ;;  %v1936_v0 = vld [vmem:[%s3359_s0 + $0x70] sm:$0xff]  ;;  %v1944_v1 = vld [vmem:[%s3359_s0 + $0x88] sm:$0xff] }
  0x1e   :  { %2490 = vmatprep.subr.msk.bf16.mxu0 %vm2884_vm3, %v2875_v46  ;;  %2523 = vmatprep.subr.msk.bf16.mxu1 %vm2884_vm3, %v2875_v46  ;;  %v1957_v2 = vld [vmem:[%s3359_s0 + $0xc8] sm:$0xff]  ;;  %v1956_v4 = vld [vmem:[%s3359_s0 + $0xc0] sm:$0xff]  ;;  %v1946_v5 = vld [vmem:[%s3359_s0 + $0x98] sm:$0xff]  ;;  %p2661_p3 = por %p2660_p2, %p2659_p1 }
  0x1f   :  { %v1959_v6 = vld [vmem:[%s3359_s0 + $0xd8] sm:$0xff]  ;;  %v1948_v9 = vld [vmem:[%s3359_s0 + $0xa8] sm:$0xff]  ;;  %v1947_v11 = vld [vmem:[%s3359_s0 + $0xa0] sm:$0xff] }
  0x20   :  { %v1961_v10 = vld [vmem:[%s3359_s0 + $0xe8] sm:$0xff]  ;;  %v1960_v12 = vld [vmem:[%s3359_s0 + $0xe0] sm:$0xff]  ;;  %v1949_v15 = vld [vmem:[%s3359_s0 + $0xb0] sm:$0xff]  ;;  %p2662_p4 = pnand %p2661_p3, %p2655_p0 }
  0x21   :  { %2492 = vmatpush3.bf16.msra.mxu0 %v2890_v50  ;;  %2525 = vmatpush3.bf16.msra.mxu1 %v2890_v50  ;;  %v1962_v16 = vld [vmem:[%s3359_s0 + $0xf0] sm:$0xff]  ;;  %v1970_v17 = vld [vmem:[%s3362_s3 + $0x18] sm:$0xff]  ;;  %v1971_v18 = vld [vmem:[%s3362_s3 + $0x20] sm:$0xff] }
  0x22   :  { %2527 = vmatprep.subr.bf16.mxu0 %v2732_v3  ;;  %2560 = vmatprep.subr.bf16.mxu1 %v2732_v3  ;;  %v1943_v3 = vld [vmem:[%s3359_s0 + $0x80] sm:$0xff]  ;;  %v1977_v21 = vld [vmem:[%s3362_s3 + $0x30] sm:$0xff]  ;;  %v1978_v22 = vld [vmem:[%s3362_s3 + $0x38] sm:$0xff] }
  0x23   :  { %v2599_v23 = vpack.c.bf16 %v1978_v22, %v1977_v21  ;;  %v1972_v25 = vld [vmem:[%s3362_s3 + $0x28] sm:$0xf]  ;;  %v1979_v26 = vld [vmem:[%s3362_s3 + $0x40] sm:$0xf] }
  0x24   :  { %149 = vmatmul.mubr.f32.vlgmr.msra.gmra.mrb[0].mxu0 %v59_v51  ;;  %255 = vmatmul.mubr.f32.vlgmr.msra.gmra.mrb[0].mxu1 %v1930_v52 }
  0x25   :  { %2529 = vmatpush3.bf16.msra.mxu0 %v2743_v7  ;;  %2562 = vmatpush3.bf16.msra.mxu1 %v2743_v7  ;;  %v1945_v7 = vld [vmem:[%s3359_s0 + $0x90] sm:$0xff] }
  0x26   :  { %2531 = vmatprep.subr.bf16.mxu0 %v2745_v8  ;;  %2564 = vmatprep.subr.bf16.mxu1 %v2745_v8  ;;  %v1958_v8 = vld [vmem:[%s3359_s0 + $0xd0] sm:$0xff] }
  0x27   :  { %1927 = vmatprep.mubr.msk.f32.mxu0 %vm67_vm0, %v62_v53  ;;  %1940 = vmatprep.mubr.msk.f32.mxu1 %vm67_vm0, %v1933_v54 }
  0x28   :  { %154 = vmatmul.mubr.f32.gmra.mrb[2].mxu0 %v61_v55  ;;  %260 = vmatmul.mubr.f32.gmra.mrb[2].mxu1 %v1932_v56 }
  0x29   :  { %2533 = vmatpush3.bf16.msra.mxu0 %v2763_v13  ;;  %2566 = vmatpush3.bf16.msra.mxu1 %v2763_v13  ;;  %v1950_v13 = vld [vmem:[%s3359_s0 + $0xb8] sm:$0xff] }
  0x2a   :  { %2535 = vmatprep.subr.bf16.mxu0 %v2767_v14  ;;  %2568 = vmatprep.subr.bf16.mxu1 %v2767_v14  ;;  %v1963_v14 = vld [vmem:[%s3359_s0 + $0xf8] sm:$0xff] }
  0x2b   :  { %1928 = vmatprep.mubr.msk.f32.mxu0 %vm67_vm0, %v64_v57  ;;  %1941 = vmatprep.mubr.msk.f32.mxu1 %vm67_vm0, %v1935_v58 }
  0x2c   :  { %159 = vmatmul.mubr.f32.gmra.mrb[4].mxu0 %v63_v59  ;;  %265 = vmatmul.mubr.f32.gmra.mrb[4].mxu1 %v1934_v60 }
  0x2d   :  { %2537 = vmatpush3.bf16.msra.mxu0 %v2783_v19  ;;  %2570 = vmatpush3.bf16.msra.mxu1 %v2783_v19  ;;  %v2679_v19 = vmov 0.0|0.0  }
  0x2e   :  { %2539 = vmatprep.subr.bf16.mxu0 %v2787_v20  ;;  %2572 = vmatprep.subr.bf16.mxu1 %v2787_v20  ;;  %v2593_v20 = vpack.c.bf16 %v1971_v18, %v1970_v17 }
  0x2f   :  { %1929 = vmatprep.mubr.msk.f32.mxu0 %vm67_vm0, %v66_v61  ;;  %1942 = vmatprep.mubr.msk.f32.mxu1 %vm67_vm0, %v1937_v62 }
  0x30   :  { %164 = vmatmul.mubr.f32.gmra.mrb[6].mxu0 %v65_v63  ;;  %270 = vmatmul.mubr.f32.gmra.mrb[6].mxu1 %v1936_v0  ;;  %v3073_v0 = vld [vmem:[%s3361_s2] ss:$0 sm:$0xff] }
  0x31   :  { %2541 = vmatpush3.bf16.msra.mxu0 %v2809_v27  ;;  %2574 = vmatpush3.bf16.msra.mxu1 %v2809_v27 }
  0x32   :  { %2543 = vmatprep.subr.bf16.mxu0 %v2813_v28  ;;  %2576 = vmatprep.subr.bf16.mxu1 %v2813_v28 }
  0x33   :  { %1952 = vmatprep.mubr.msk.f32.mxu0 %vm67_vm0, %v1944_v1  ;;  %1965 = vmatprep.mubr.msk.f32.mxu1 %vm67_vm0, %v1957_v2 }
  0x35   :  { %2545 = vmatpush3.bf16.msra.mxu0 %v2831_v33  ;;  %2578 = vmatpush3.bf16.msra.mxu1 %v2831_v33 }
  0x36   :  { %2547 = vmatprep.subr.bf16.mxu0 %v2835_v34  ;;  %2580 = vmatprep.subr.bf16.mxu1 %v2835_v34 }
  0x39   :  { %2549 = vmatpush3.bf16.msra.mxu0 %v2851_v39  ;;  %2582 = vmatpush3.bf16.msra.mxu1 %v2851_v39 }
  0x3a   :  { %2551 = vmatprep.subr.bf16.mxu0 %v2855_v40  ;;  %2584 = vmatprep.subr.bf16.mxu1 %v2855_v40 }
  0x3d   :  { %2553 = vmatpush3.bf16.msra.mxu0 %v2871_v45  ;;  %2586 = vmatpush3.bf16.msra.mxu1 %v2871_v45 }
  0x3e   :  { %2556 = vmatprep.subr.msk.bf16.mxu0 %vm2884_vm3, %v2875_v46  ;;  %2589 = vmatprep.subr.msk.bf16.mxu1 %vm2884_vm3, %v2875_v46 }
  0x41   :  { %2558 = vmatpush3.bf16.msra.mxu0 %v2890_v50  ;;  %2591 = vmatpush3.bf16.msra.mxu1 %v2890_v50 }
  0x42   :  { %2592 = vmatprep.subr.bf16.mxu1 %v2679_v19  ;;  %2598 = vmatprep.subr.bf16.mxu0 %v2679_v19 }
  0x44   :  { %365 = vmatmul.mubr.f32.vlgmr.msra.gmra.mrb[8].mxu0 %v1943_v3  ;;  %475 = vmatmul.mubr.f32.vlgmr.msra.gmra.mrb[8].mxu1 %v1956_v4 }
  0x45   :  { %1953 = vmatprep.mubr.msk.f32.mxu0 %vm67_vm0, %v1946_v5  ;;  %1966 = vmatprep.mubr.msk.f32.mxu1 %vm67_vm0, %v1959_v6  ;;  %v514_v6 = vld [vmem:[%s3362_s3] sm:$0xff] }
  0x46   :  { %2594 = vmatpush3.bf16.msra.mxu1 %v2593_v20  ;;  %2600 = vmatpush3.bf16.msra.mxu0 %v2599_v23 }
  0x47   :  { %2303 = vmatprep.subr.mxu1 %v2680_v24  ;;  %2321 = vmatprep.subr.mxu0 %v2680_v24 }
  0x48   :  { %370 = vmatmul.mubr.f32.gmra.mrb[10].mxu0 %v1945_v7  ;;  %480 = vmatmul.mubr.f32.gmra.mrb[10].mxu1 %v1958_v8 }
  0x49   :  { %1954 = vmatprep.mubr.msk.f32.mxu0 %vm67_vm0, %v1948_v9  ;;  %1967 = vmatprep.mubr.msk.f32.mxu1 %vm67_vm0, %v1961_v10 }
  0x4a   :  { %2304 = vmatpush3.msk.msra.mxu1 %vm526_vm4, %v1972_v25  ;;  %2322 = vmatpush3.msk.msra.mxu0 %vm526_vm4, %v1979_v26 }
  0x4b   :  { %2595 = vmatprep.subr.bf16.mxu1 %v2679_v19  ;;  %2604 = vmatprep.subr.bf16.mxu0 %v2679_v19 }
  0x4c   :  { %375 = vmatmul.mubr.f32.gmra.mrb[12].mxu0 %v1947_v11  ;;  %485 = vmatmul.mubr.f32.gmra.mrb[12].mxu1 %v1960_v12  ;;  %v515_v11 = vld [vmem:[%s3362_s3 + $0x8] sm:$0xff]  ;;  %v1987_v12 = vld [vmem:[%s3362_s3 + $0x60] sm:$0xff] }
  0x4d   :  { %1955 = vmatprep.mubr.msk.f32.mxu0 %vm67_vm0, %v1950_v13  ;;  %1968 = vmatprep.mubr.msk.f32.mxu1 %vm67_vm0, %v1963_v14  ;;  %v1988_v13 = vld [vmem:[%s3362_s3 + $0x68] sm:$0xff]  ;;  %v2596_v21 = vpack.c.bf16 %v515_v11, %v514_v6  ;;  %v2027_v6 = vld [vmem:[%s3362_s3 + $0x120] sm:$0xff] }
  0x4e   :  { %v2605_v22 = vpack.c.bf16 %v1988_v13, %v1987_v12 }
  0x50   :  { %380 = vmatmul.mubr.f32.gmra.mrb[14].mxu0 %v1949_v15  ;;  %490 = vmatmul.mubr.f32.gmra.mrb[14].mxu1 %v1962_v16 }
  0x51   :  { %2305 = vmatprep.mubr.msk.f32.mxu1 %vm2681_vm5, %v2680_v24  ;;  %2323 = vmatprep.mubr.msk.f32.mxu0 %vm2681_vm5, %v2680_v24 }
  0xf7   :  { %v2083_v27 = vpop.f32.mrb[0].mxu0  ;;  %v2127_v28 = vpop.f32.mrb[0].mxu1 }
  0xf8   :  { %v2084_v29 = vpop.f32.mrb[1].mxu0  ;;  %v2128_v30 = vpop.f32.mrb[1].mxu1 }
  0xf9   :  { %v2085_v31 = vadd.f32 %v2084_v29, %v2083_v27  ;;  %v2129_v32 = vadd.f32 %v2128_v30, %v2127_v28 }
  0xfb   :  { %v275_v33 = vmax.f32 %v2085_v31, %v2129_v32  ;;  %v2086_v34 = vpop.f32.mrb[2].mxu0  ;;  %v2130_v35 = vpop.f32.mrb[2].mxu1 }
  0xfc   :  { %v2087_v36 = vpop.f32.mrb[3].mxu0  ;;  %v2131_v37 = vpop.f32.mrb[3].mxu1 }
  0xfd   :  { %v2088_v38 = vadd.f32 %v2087_v36, %v2086_v34  ;;  %v2132_v39 = vadd.f32 %v2131_v37, %v2130_v35  ;;  %v1982_v34 = vld [vmem:[%s3362_s3 + $0x48] sm:$0xff]  ;;  %v1983_v36 = vld [vmem:[%s3362_s3 + $0x50] sm:$0xff] }
  0xfe   :  { %v1997_v37 = vld [vmem:[%s3362_s3 + $0x90] sm:$0xff] }
  0xff   :  { %v276_v40 = vmax.f32 %v2088_v38, %v2132_v39  ;;  %v2089_v41 = vpop.f32.mrb[4].mxu0  ;;  %v2133_v42 = vpop.f32.mrb[4].mxu1  ;;  %v1998_v38 = vld [vmem:[%s3362_s3 + $0x98] sm:$0xff] }
 0x100   :  { %v2090_v43 = vpop.f32.mrb[5].mxu0  ;;  %v2134_v44 = vpop.f32.mrb[5].mxu1 }
 0x101   :  { %v2091_v45 = vadd.f32 %v2090_v43, %v2089_v41  ;;  %v2135_v46 = vadd.f32 %v2134_v44, %v2133_v42  ;;  %v1989_v41 = vld [vmem:[%s3362_s3 + $0x70] sm:$0xf]  ;;  %v2602_v43 = vpack.c.bf16 %v1983_v36, %v1982_v34  ;;  %v2611_v44 = vpack.c.bf16 %v1998_v38, %v1997_v37  ;;  %v2044_v38 = vld [vmem:[%s3362_s3 + $0x178] sm:$0xf] }
 0x102   :  { %v2043_v34 = vld [vmem:[%s3362_s3 + $0x170] sm:$0xff] }
 0x103   :  { %v277_v47 = vmax.f32 %v2091_v45, %v2135_v46  ;;  %v2092_v48 = vpop.f32.mrb[6].mxu0  ;;  %v2136_v49 = vpop.f32.mrb[6].mxu1  ;;  %v1992_v46 = vld [vmem:[%s3362_s3 + $0x78] sm:$0xff] }
 0x104   :  { %v2093_v50 = vpop.f32.mrb[7].mxu0  ;;  %v2137_v51 = vpop.f32.mrb[7].mxu1 }
 0x105   :  { %v2094_v52 = vadd.f32 %v2093_v50, %v2092_v48  ;;  %v2138_v53 = vadd.f32 %v2137_v51, %v2136_v49  ;;  %v2007_v48 = vld [vmem:[%s3362_s3 + $0xc0] sm:$0xff]  ;;  %v2008_v49 = vld [vmem:[%s3362_s3 + $0xc8] sm:$0xff]  ;;  %v1984_v50 = vld [vmem:[%s3362_s3 + $0x58] sm:$0xf] }
 0x106   :  { %v1999_v51 = vld [vmem:[%s3362_s3 + $0xa0] sm:$0xf] }
 0x107   :  { %v278_v54 = vmax.f32 %v2094_v52, %v2138_v53 }
 0x117   :  { %v2171_v55 = vpop.f32.mrb[8].mxu0  ;;  %v2215_v56 = vpop.f32.mrb[8].mxu1 }
 0x118   :  { %v2172_v57 = vpop.f32.mrb[9].mxu0  ;;  %v2216_v58 = vpop.f32.mrb[9].mxu1 }
 0x119   :  { %v2173_v59 = vadd.f32 %v2172_v57, %v2171_v55  ;;  %v2217_v60 = vadd.f32 %v2216_v58, %v2215_v56  ;;  %v2002_v56 = vld [vmem:[%s3362_s3 + $0xa8] sm:$0xff]  ;;  %v2003_v58 = vld [vmem:[%s3362_s3 + $0xb0] sm:$0xff] }
 0x11b   :  { %v385_v61 = vmax.f32 %v275_v33, %v2173_v59  ;;  %v2174_v62 = vpop.f32.mrb[10].mxu0  ;;  %v2218_v63 = vpop.f32.mrb[10].mxu1  ;;  %v2017_v59 = vld [vmem:[%s3362_s3 + $0xf0] sm:$0xff] }
 0x11c   :  { %v2175_v1 = vpop.f32.mrb[11].mxu0  ;;  %v2219_v2 = vpop.f32.mrb[11].mxu1 }
 0x11d   :  { %v495_v3 = vmax.f32 %v385_v61, %v2217_v60  ;;  %v2176_v4 = vadd.f32 %v2175_v1, %v2174_v62  ;;  %v2220_v5 = vadd.f32 %v2219_v2, %v2218_v63  ;;  %v2018_v60 = vld [vmem:[%s3362_s3 + $0xf8] sm:$0xff]  ;;  %v1994_v61 = vld [vmem:[%s3362_s3 + $0x88] sm:$0xf]  ;;  %v2009_v62 = vld [vmem:[%s3362_s3 + $0xd0] sm:$0xf]  ;;  %v2614_v1 = vpack.c.bf16 %v2003_v58, %v2002_v56 }
 0x11e   :  { %v2623_v2 = vpack.c.bf16 %v2018_v60, %v2017_v59 }
 0x11f   :  { %v506_v7 = vadd.f32 %v3073_v0, %v495_v3  ;;  %v386_v8 = vmax.f32 %v276_v40, %v2176_v4  ;;  %v2177_v9 = vpop.f32.mrb[12].mxu0  ;;  %v2221_v10 = vpop.f32.mrb[12].mxu1  ;;  %v516_v40 = vld [vmem:[%s3362_s3 + $0x10] sm:$0xf]  ;;  %v2012_v4 = vld [vmem:[%s3362_s3 + $0xd8] sm:$0xff] }
 0x120   :  { %v2178_v14 = vpop.f32.mrb[13].mxu0  ;;  %v2222_v15 = vpop.f32.mrb[13].mxu1 }
 0x121   :  { %v510_v16 = vmax.f32 %v506_v7, 0.0  ;;  %v496_v17 = vmax.f32 %v386_v8, %v2220_v5  ;;  %v2179_v18 = vadd.f32 %v2178_v14, %v2177_v9  ;;  %v3088_v20 = vadd.f32 %v2222_v15, %v2221_v10  ;;  %v2013_v5 = vld [vmem:[%s3362_s3 + $0xe0] sm:$0xff]  ;;  %v2028_v7 = vld [vmem:[%s3362_s3 + $0x128] sm:$0xff]  ;;  %v2004_v8 = vld [vmem:[%s3362_s3 + $0xb8] sm:$0xf] }
 0x122   :  { %v2019_v9 = vld [vmem:[%s3362_s3 + $0x100] sm:$0xf]  ;;  %v2620_v11 = vpack.c.bf16 %v2013_v5, %v2012_v4  ;;  %v2629_v12 = vpack.c.bf16 %v2028_v7, %v2027_v6  ;;  %v2022_v14 = vld [vmem:[%s3362_s3 + $0x108] sm:$0xff] }
 0x123   :  { %v522_v23 = vrot.slane %v510_v16, 2  ;;  %v679_v25 = vrot.slane %v510_v16, 4  ;;  %v387_v26 = vmax.f32 %v277_v47, %v2179_v18  ;;  %v2180_v27 = vpop.f32.mrb[14].mxu0  ;;  %v2224_v28 = vpop.f32.mrb[14].mxu1  ;;  %v507_v35 = vadd.f32 %v3073_v0, %v496_v17  ;;  %v1993_v47 = vld [vmem:[%s3362_s3 + $0x80] sm:$0xff]  ;;  %v2037_v17 = vld [vmem:[%s3362_s3 + $0x150] sm:$0xff] }
 0x124   :  { %v2181_v29 = vpop.f32.mrb[15].mxu0  ;;  %v2225_v30 = vpop.f32.mrb[15].mxu1  ;;  %v760_v52 = vrot.slane %v510_v16, 6  ;;  %v2608_v53 = vpack.c.bf16 %v1993_v47, %v1992_v46  ;;  %v2038_v18 = vld [vmem:[%s3362_s3 + $0x158] sm:$0xff]  ;;  %v1822_v46 = vld [vmem:[%s3364_s5 + $0x20] sm:$0xff]  ;;  %v1823_v47 = vld [vmem:[%s3364_s5 + $0x28] sm:$0xff] }
 0x125   :  { %v497_v31 = vmax.f32 %v387_v26, %v3088_v20  ;;  %v2182_v32 = vadd.f32 %v2181_v29, %v2180_v27  ;;  %2306 = vmatmul.mubr.msk.f32.vlgmr.msra.gmra.mrb[16].mxu1 %vm523_vm6, %v522_v23  ;;  %2324 = vmatmul.mubr.msk.f32.vlgmr.msra.gmra.mrb[16].mxu0 %vm523_vm6, %v679_v25  ;;  %v3093_v33 = vadd.f32 %v2225_v30, %v2224_v28  ;;  %v3124_v45 = vmax.f32 %v507_v35, 0.0  ;;  %v2029_v20 = vld [vmem:[%s3362_s3 + $0x130] sm:$0xf]  ;;  %v2032_v26 = vld [vmem:[%s3362_s3 + $0x138] sm:$0xff]  ;;  %v2033_v27 = vld [vmem:[%s3362_s3 + $0x140] sm:$0xff] }
 0x126   :  { %2597 = vmatpush3.bf16.msra.mxu1 %v2596_v21  ;;  %2606 = vmatpush3.bf16.msra.mxu0 %v2605_v22  ;;  %v2635_v23 = vpack.c.bf16 %v2038_v18, %v2037_v17  ;;  %v2024_v28 = vld [vmem:[%s3362_s3 + $0x118] sm:$0xf]  ;;  %v2039_v29 = vld [vmem:[%s3362_s3 + $0x160] sm:$0xf]  ;;  %v2632_v30 = vpack.c.bf16 %v2033_v27, %v2032_v26  ;;  %v2034_v35 = vld [vmem:[%s3362_s3 + $0x148] sm:$0xf] }
 0x127   :  { %v3108_v39 = vmax.f32 %v278_v54, %v2182_v32  ;;  %2312 = vmatprep.subr.mxu1 %v2680_v24  ;;  %2339 = vmatprep.subr.mxu0 %v2680_v24  ;;  %v2617_v54 = vpack.c.bf16 %v2008_v49, %v2007_v48  ;;  %v1003_v55 = vrot.slane %v3124_v45, 4  ;;  %v508_v57 = vadd.f32 %v3073_v0, %v497_v31  ;;  %v1824_v49 = vld [vmem:[%s3364_s5 + $0x30] sm:$0x3] }
 0x128   :  { %2314 = vmatprep.mubr.msk.f32.mxu1 %vm2681_vm5, %v2680_v24  ;;  %2341 = vmatprep.mubr.msk.f32.mxu0 %vm2681_vm5, %v2680_v24  ;;  %v922_v63 = vrot.slane %v3124_v45, 2  ;;  %v1084_v10 = vrot.slane %v3124_v45, 6  ;;  %v2647_v48 = vpack.c.bf16 %v1823_v47, %v1822_v46 }
 0x129   :  { %v498_v42 = vmax.f32 %v3108_v39, %v3093_v33  ;;  %v3190_v3 = vmax.f32 %v508_v57, 0.0  ;;  %v2042_v33 = vld [vmem:[%s3362_s3 + $0x168] sm:$0xff] }
 0x12a   :  { %2313 = vmatpush3.msk.msra.mxu1 %vm526_vm4, %v516_v40  ;;  %2340 = vmatpush3.msk.msra.mxu0 %vm526_vm4, %v1989_v41  ;;  %v2638_v36 = vpack.c.bf16 %v2043_v34, %v2042_v33  ;;  %v1818_v40 = vld [vmem:[%s3364_s5] sm:$0xff]  ;;  %v1819_v41 = vld [vmem:[%s3364_s5 + $0x8] sm:$0xff] }
 0x12b   :  { %2315 = vmatmul.mubr.msk.f32.vlgmr.msra.gmra.mrb[18].mxu1 %vm523_vm6, %v510_v16  ;;  %2601 = vmatprep.subr.bf16.mxu1 %v2679_v19  ;;  %v1327_v13 = vrot.slane %v3190_v3, 4  ;;  %v509_v15 = vadd.f32 %v3073_v0, %v498_v42  ;;  %v2023_v16 = vld [vmem:[%s3362_s3 + $0x110] sm:$0xff]  ;;  %v2014_v0 = vld [vmem:[%s3362_s3 + $0xe8] sm:$0xf]  ;;  %v1246_v21 = vrot.slane %v3190_v3, 2  ;;  %v1408_v31 = vrot.slane %v3190_v3, 6 }
 0x12c   :  { %2342 = vmatmul.mubr.msk.f32.vlgmr.msra.gmra.mrb[18].mxu0 %vm523_vm6, %v3124_v45  ;;  %2610 = vmatprep.subr.bf16.mxu0 %v2679_v19  ;;  %v2626_v22 = vpack.c.bf16 %v2023_v16, %v2022_v14  ;;  %v2641_v42 = vpack.c.bf16 %v1819_v41, %v1818_v40 }
 0x12d   :  { %2603 = vmatpush3.bf16.msra.mxu1 %v2602_v43  ;;  %2612 = vmatpush3.bf16.msra.mxu0 %v2611_v44  ;;  %v513_v25 = vmax.f32 %v509_v15, 0.0  ;;  %v1820_v43 = vld [vmem:[%s3364_s5 + $0x10] sm:$0xff]  ;;  %v1821_v44 = vld [vmem:[%s3364_s5 + $0x18] sm:$0xff] }
 0x12e   :  { %2330 = vmatprep.subr.mxu1 %v2680_v24  ;;  %2357 = vmatprep.subr.mxu0 %v2680_v24  ;;  %v2644_v45 = vpack.c.bf16 %v1821_v44, %v1820_v43 }
 0x12f   :  { %2332 = vmatprep.mubr.msk.f32.mxu1 %vm2681_vm5, %v2680_v24  ;;  %2359 = vmatprep.mubr.msk.f32.mxu0 %vm2681_vm5, %v2680_v24  ;;  %v1651_v32 = vrot.slane %v513_v25, 4  ;;  %v1570_v37 = vrot.slane %v513_v25, 2  ;;  %v1732_v39 = vrot.slane %v513_v25, 6 }
 0x131   :  { %2331 = vmatpush3.msk.msra.mxu1 %vm526_vm4, %v1984_v50  ;;  %2358 = vmatpush3.msk.msra.mxu0 %vm526_vm4, %v1999_v51 }
 0x132   :  { %2333 = vmatmul.mubr.msk.f32.vlgmr.msra.gmra.mrb[20].mxu1 %vm523_vm6, %v760_v52  ;;  %2607 = vmatprep.subr.bf16.mxu1 %v2679_v19 }
 0x133   :  { %2360 = vmatmul.mubr.msk.f32.vlgmr.msra.gmra.mrb[20].mxu0 %vm523_vm6, %v1003_v55  ;;  %2616 = vmatprep.subr.bf16.mxu0 %v2679_v19 }
 0x134   :  { %2609 = vmatpush3.bf16.msra.mxu1 %v2608_v53  ;;  %2618 = vmatpush3.bf16.msra.mxu0 %v2617_v54 }
 0x135   :  { %2348 = vmatprep.subr.mxu1 %v2680_v24  ;;  %2375 = vmatprep.subr.mxu0 %v2680_v24 }
 0x136   :  { %2350 = vmatprep.mubr.msk.f32.mxu1 %vm2681_vm5, %v2680_v24  ;;  %2377 = vmatprep.mubr.msk.f32.mxu0 %vm2681_vm5, %v2680_v24 }
 0x138   :  { %2349 = vmatpush3.msk.msra.mxu1 %vm526_vm4, %v1994_v61  ;;  %2376 = vmatpush3.msk.msra.mxu0 %vm526_vm4, %v2009_v62 }
 0x139   :  { %2351 = vmatmul.mubr.msk.f32.vlgmr.msra.gmra.mrb[22].mxu1 %vm523_vm6, %v922_v63  ;;  %2613 = vmatprep.subr.bf16.mxu1 %v2679_v19 }
 0x13a   :  { %2378 = vmatmul.mubr.msk.f32.vlgmr.msra.gmra.mrb[22].mxu0 %vm523_vm6, %v3190_v3  ;;  %2622 = vmatprep.subr.bf16.mxu0 %v2679_v19 }
 0x13b   :  { %2615 = vmatpush3.bf16.msra.mxu1 %v2614_v1  ;;  %2624 = vmatpush3.bf16.msra.mxu0 %v2623_v2 }
 0x13c   :  { %2366 = vmatprep.subr.mxu1 %v2680_v24  ;;  %2393 = vmatprep.subr.mxu0 %v2680_v24 }
 0x13d   :  { %2368 = vmatprep.mubr.msk.f32.mxu1 %vm2681_vm5, %v2680_v24  ;;  %2395 = vmatprep.mubr.msk.f32.mxu0 %vm2681_vm5, %v2680_v24 }
 0x13f   :  { %2367 = vmatpush3.msk.msra.mxu1 %vm526_vm4, %v2004_v8  ;;  %2394 = vmatpush3.msk.msra.mxu0 %vm526_vm4, %v2019_v9 }
 0x140   :  { %2369 = vmatmul.mubr.msk.f32.vlgmr.msra.gmra.mrb[24].mxu1 %vm523_vm6, %v1084_v10  ;;  %2619 = vmatprep.subr.bf16.mxu1 %v2679_v19 }
 0x141   :  { %2396 = vmatmul.mubr.msk.f32.vlgmr.msra.gmra.mrb[24].mxu0 %vm523_vm6, %v1327_v13  ;;  %2628 = vmatprep.subr.bf16.mxu0 %v2679_v19 }
 0x142   :  { %2621 = vmatpush3.bf16.msra.mxu1 %v2620_v11  ;;  %2630 = vmatpush3.bf16.msra.mxu0 %v2629_v12 }
 0x143   :  { %2384 = vmatprep.subr.mxu1 %v2680_v24  ;;  %2411 = vmatprep.subr.mxu0 %v2680_v24 }
 0x144   :  { %2386 = vmatprep.mubr.msk.f32.mxu1 %vm2681_vm5, %v2680_v24  ;;  %2413 = vmatprep.mubr.msk.f32.mxu0 %vm2681_vm5, %v2680_v24 }
 0x146   :  { %2385 = vmatpush3.msk.msra.mxu1 %vm526_vm4, %v2014_v0  ;;  %2412 = vmatpush3.msk.msra.mxu0 %vm526_vm4, %v2029_v20 }
 0x147   :  { %2387 = vmatmul.mubr.msk.f32.vlgmr.msra.gmra.mrb[26].mxu1 %vm523_vm6, %v1246_v21  ;;  %2625 = vmatprep.subr.bf16.mxu1 %v2679_v19 }
 0x148   :  { %2414 = vmatmul.mubr.msk.f32.vlgmr.msra.gmra.mrb[26].mxu0 %vm523_vm6, %v513_v25  ;;  %2634 = vmatprep.subr.bf16.mxu0 %v2679_v19 }
 0x149   :  { %2627 = vmatpush3.bf16.msra.mxu1 %v2626_v22  ;;  %2636 = vmatpush3.bf16.msra.mxu0 %v2635_v23 }
 0x14a   :  { %2402 = vmatprep.subr.mxu1 %v2680_v24  ;;  %2429 = vmatprep.subr.mxu0 %v2680_v24 }
 0x14b   :  { %2404 = vmatprep.mubr.msk.f32.mxu1 %vm2681_vm5, %v2680_v24  ;;  %2431 = vmatprep.mubr.msk.f32.mxu0 %vm2681_vm5, %v2680_v24 }
 0x14d   :  { %2403 = vmatpush3.msk.msra.mxu1 %vm526_vm4, %v2024_v28  ;;  %2430 = vmatpush3.msk.msra.mxu0 %vm526_vm4, %v2039_v29 }
 0x14e   :  { %2405 = vmatmul.mubr.msk.f32.vlgmr.msra.gmra.mrb[28].mxu1 %vm523_vm6, %v1408_v31  ;;  %2631 = vmatprep.subr.bf16.mxu1 %v2679_v19  ;;  %v2047_v31 = vld [vmem:[%s3363_s4] ss:$0 sm:$0xff] }
 0x14f   :  { %2432 = vmatmul.mubr.msk.f32.vlgmr.msra.gmra.mrb[28].mxu0 %vm523_vm6, %v1651_v32  ;;  %2633 = vmatpush3.bf16.msra.mxu1 %v2632_v30 }
 0x150   :  { %2420 = vmatprep.subr.mxu1 %v2680_v24  ;;  %2422 = vmatprep.mubr.msk.f32.mxu1 %vm2681_vm5, %v2680_v24 }
 0x151   :  { %2640 = vmatprep.subr.bf16.mxu0 %v2679_v19  ;;  %2457 = vmatprep.mubr.msk.f32.mxu0 %vm2681_vm5, %v2680_v24 }
 0x152   :  { %2642 = vmatpush3.bf16.msra.mxu0 %v2641_v42 }
 0x153   :  { %2421 = vmatpush3.msk.msra.mxu1 %vm526_vm4, %v2034_v35  ;;  %2643 = vmatprep.subr.bf16.mxu0 %v2679_v19 }
 0x154   :  { %2423 = vmatmul.mubr.msk.f32.vlgmr.msra.gmra.mrb[30].mxu1 %vm523_vm6, %v1570_v37  ;;  %2637 = vmatprep.subr.bf16.mxu1 %v2679_v19 }
 0x155   :  { %2639 = vmatpush3.bf16.msra.mxu1 %v2638_v36  ;;  %2440 = vmatprep.mubr.msk.f32.mxu1 %vm2681_vm5, %v2680_v24  ;;  %v2048_v36 = vld [vmem:[%s3365_s6] ss:$0 sm:$0xff] }
 0x156   :  { %2438 = vmatprep.subr.mxu1 %v2680_v24  ;;  %2645 = vmatpush3.bf16.msra.mxu0 %v2644_v45 }
 0x157   :  { %2646 = vmatprep.subr.bf16.mxu0 %v2679_v19 }
 0x159   :  { %2439 = vmatpush3.msk.msra.mxu1 %vm526_vm4, %v2044_v38 }
 0x15a   :  { %2441 = vmatmul.mubr.msk.f32.vlgmr.msra.gmra.mrb[32].mxu1 %vm523_vm6, %v1732_v39  ;;  %2648 = vmatpush3.bf16.msra.mxu0 %v2647_v48 }
 0x15b   :  { %2455 = vmatprep.subr.mxu0 %v2680_v24 }
 0x15e   :  { %2456 = vmatpush3.msk.msra.mxu0 %vm80_vm1, %v1824_v49 }
 0x1f8   :  { %v596_v50 = vpop.f32.mrb[16].mxu1  ;;  %v751_v19 = vpop.f32.mrb[16].mxu0 }
 0x1f9   :  { %v2307_v51 = vpop.f32.mrb[17].mxu1  ;;  %v2325_v52 = vpop.f32.mrb[17].mxu0 }
 0x1fe   :  { %v671_v53 = vpop.f32.mrb[18].mxu1 }
 0x1ff   :  { %v672_v54 = vadd.f32 %v671_v53, %v596_v50  ;;  %v913_v55 = vpop.f32.mrb[18].mxu0  ;;  %v2316_v56 = vpop.f32.mrb[19].mxu1 }
 0x200   :  { %v2343_v57 = vpop.f32.mrb[19].mxu0 }
 0x201   :  { %v755_v58 = vadd.f32 %v751_v19, %v672_v54 }
 0x205   :  { %v832_v59 = vpop.f32.mrb[20].mxu1 }
 0x206   :  { %v836_v60 = vadd.f32 %v832_v59, %v755_v58  ;;  %v1075_v61 = vpop.f32.mrb[20].mxu0  ;;  %v2334_v24 = vpop.f32.mrb[21].mxu1 }
 0x207   :  { %v2361_v62 = vpop.f32.mrb[21].mxu0 }
 0x208   :  { %v917_v63 = vadd.f32 %v913_v55, %v836_v60 }
 0x20c   :  { %v994_v1 = vpop.f32.mrb[22].mxu1 }
 0x20d   :  { %v998_v2 = vadd.f32 %v994_v1, %v917_v63  ;;  %v1237_v3 = vpop.f32.mrb[22].mxu0  ;;  %v2352_v4 = vpop.f32.mrb[23].mxu1 }
 0x20e   :  { %v2379_v5 = vpop.f32.mrb[23].mxu0 }
 0x20f   :  { %v1079_v6 = vadd.f32 %v1075_v61, %v998_v2 }
 0x213   :  { %v1156_v7 = vpop.f32.mrb[24].mxu1 }
 0x214   :  { %v1160_v8 = vadd.f32 %v1156_v7, %v1079_v6  ;;  %v1399_v9 = vpop.f32.mrb[24].mxu0  ;;  %v2370_v10 = vpop.f32.mrb[25].mxu1 }
 0x215   :  { %v2397_v11 = vpop.f32.mrb[25].mxu0 }
 0x216   :  { %v1241_v12 = vadd.f32 %v1237_v3, %v1160_v8 }
 0x21a   :  { %v1318_v13 = vpop.f32.mrb[26].mxu1 }
 0x21b   :  { %v1322_v14 = vadd.f32 %v1318_v13, %v1241_v12  ;;  %v1561_v15 = vpop.f32.mrb[26].mxu0  ;;  %v2388_v16 = vpop.f32.mrb[27].mxu1 }
 0x21c   :  { %v2415_v17 = vpop.f32.mrb[27].mxu0 }
 0x21d   :  { %v1403_v18 = vadd.f32 %v1399_v9, %v1322_v14 }
 0x221   :  { %v1480_v0 = vpop.f32.mrb[28].mxu1 }
 0x222   :  { %v1484_v20 = vadd.f32 %v1480_v0, %v1403_v18  ;;  %v1723_v21 = vpop.f32.mrb[28].mxu0  ;;  %v2406_v22 = vpop.f32.mrb[29].mxu1 }
 0x223   :  { %v2433_v23 = vpop.f32.mrb[29].mxu0 }
 0x224   :  { %v1565_v25 = vadd.f32 %v1561_v15, %v1484_v20 }
 0x227   :  { %v1642_v26 = vpop.f32.mrb[30].mxu1 }
 0x228   :  { %v1646_v27 = vadd.f32 %v1642_v26, %v1565_v25  ;;  %v2424_v28 = vpop.f32.mrb[31].mxu1 }
 0x22a   :  { %v1727_v29 = vadd.f32 %v1723_v21, %v1646_v27 }
 0x22d   :  { %v1804_v30 = vpop.f32.mrb[32].mxu1 }
 0x22e   :  { %v1808_v32 = vadd.f32 %v1804_v30, %v1727_v29  ;;  %v2442_v33 = vpop.f32.mrb[33].mxu1 }
 0x230   :  { %v1816_v34 = vadd.f32 %v2047_v31, %v1808_v32 }
 0x232   :  { %v1817_v35 = vmax.f32 %v1816_v34, 0.0 }
 0x234   :  { %2458 = vmatmul.mubr.msk.f32.vlgmr.msra.gmra.mrb[30].mxu0 %vm1832_vm7, %v1817_v35 }
 0x307   :  { %v1905_v37 = vpop.f32.mrb[30].mxu0 }
 0x308   :  { %v1906_v38 = vadd.f32 %v2048_v36, %v1905_v37  ;;  %v2459_v39 = vpop.f32.mrb[31].mxu0 }
 0x30a   :  { %1910 = vst.msk [vmem:[#allocation2] sm:$0x3] %vm1909_vm8, %v1906_v38 }
 0x30b   :  { %2665 = shalt.err (!%p2662_p4)
}
 0x30c   :  { %s2666_s23 = scalar_lea.hbm %s3366_s7, 32 }
 0x30d   :  { %p2667_p5 = scmp.ne.s32.totalorder %s3366_s7, %s2666_s23  ;;  %p2670_p6 = scmp.lt.u32.totalorder %s2666_s23, %s3366_s7 }
 0x30f   :  { %p2672_p7 = pnand %p2670_p6, %p2667_p5 }
 0x311   :  { %2675 = shalt.err (!%p2672_p7)
}
 0x312   :  { %1920 = dma.vmem_to_hbm [thread:$0]  %s1918_s21, 32, %s3366_s7, [#allocation3]  }
 0x313   :  { %2676 = dma.done.wait [#allocation3], 32  }
 0x314   :  { %2677 = vsyncadd [#allocation3], 4294967264 }
 0x315   :  { %1924 = vsyncpa [#allocation3], 1 }

</bundles_post_ra>
